<compile_context>
chip_gen: v6e
topology: v6e:2x2x1
jax: 0.10.0
libtpu: 0.0.40
codegen_flags: <defaults>
</compile_context>

<pallas_src>
import functools

import jax
import jax.numpy as jnp
from jax.experimental import pallas as pl
from jax.experimental.pallas import tpu as pltpu


def _attn_block_kernel(gamma_ref, beta_ref,
                       wq_ref, bq_ref, wk_ref, bk_ref, wv_ref, bv_ref,
                       wp_ref, bp_ref,
                       x_ref, o_ref, *, num_groups, eps):
    # x_ref / o_ref : (C, HW) for one batch element (HW is the lane-dense dim).
    # gamma/beta/b* : (C, 1) VMEM; w* : (C, C) VMEM.
    c, hw = x_ref.shape
    x = x_ref[...].astype(jnp.float32)

    # ---- GroupNorm(num_groups, eps, affine=True) ----
    cpg = c // num_groups
    if cpg == 1:                                   # one channel per group
        mean = jnp.mean(x, axis=-1, keepdims=True)
        xc = x - mean
        var = jnp.mean(xc * xc, axis=-1, keepdims=True)
        hn = xc * jax.lax.rsqrt(var + eps)
    else:
        xg = x.reshape(num_groups, cpg * hw)
        mean = jnp.mean(xg, axis=-1, keepdims=True)
        xc = xg - mean
        var = jnp.mean(xc * xc, axis=-1, keepdims=True)
        hn = (xc * jax.lax.rsqrt(var + eps)).reshape(c, hw)
    hn = hn * gamma_ref[...] + beta_ref[...]

    # ---- 1x1 convs (q, k, v) == channel matmuls on the MXU ----
    q = jnp.dot(wq_ref[...], hn, preferred_element_type=jnp.float32) + bq_ref[...]
    k = jnp.dot(wk_ref[...], hn, preferred_element_type=jnp.float32) + bk_ref[...]
    v = jnp.dot(wv_ref[...], hn, preferred_element_type=jnp.float32) + bv_ref[...]

    # ---- spatial self-attention ----
    scale = c ** -0.5
    # logits[i, j] = sum_c q[c, i] * k[c, j]
    logits = jax.lax.dot_general(
        q, k, (((0,), (0,)), ((), ())),
        preferred_element_type=jnp.float32) * scale
    m = jnp.max(logits, axis=-1, keepdims=True)
    e = jnp.exp(logits - m)
    attn = e / jnp.sum(e, axis=-1, keepdims=True)
    # h_att[c, i] = sum_j v[c, j] * attn[i, j]
    h_att = jax.lax.dot_general(
        v, attn, (((1,), (1,)), ((), ())),
        preferred_element_type=jnp.float32)

    # ---- proj_out (1x1 conv) + residual ----
    proj = jnp.dot(wp_ref[...], h_att, preferred_element_type=jnp.float32) + bp_ref[...]
    o_ref[...] = (x + proj).astype(o_ref.dtype)


def attn_block_forward(x, params, *, num_groups=32, eps=1e-6):
    """Equivalent of AttnBlock.forward for NCHW input."""
    n, c, h, w = x.shape
    hw = h * w
    xf = x.reshape(n, c, hw)                       # layout glue only

    def vec(p):
        return p.astype(jnp.float32).reshape(c, 1)

    def mat(p):
        return p.astype(jnp.float32).reshape(c, c)  # Conv2d 1x1 weight (O,I,1,1)->(O,I)

    args = (
        vec(params["gamma"]), vec(params["beta"]),
        mat(params["wq"]), vec(params["bq"]),
        mat(params["wk"]), vec(params["bk"]),
        mat(params["wv"]), vec(params["bv"]),
        mat(params["wp"]), vec(params["bp"]),
        xf,
    )

    vec_spec = pl.BlockSpec((c, 1), lambda b: (0, 0))
    mat_spec = pl.BlockSpec((c, c), lambda b: (0, 0))
    x_spec = pl.BlockSpec((pl.Squeezed(), c, hw), lambda b: (b, 0, 0))

    out = pl.pallas_call(
        functools.partial(_attn_block_kernel, num_groups=num_groups, eps=eps),
        out_shape=jax.ShapeDtypeStruct((n, c, hw), x.dtype),
        grid_spec=pltpu.PrefetchScalarGridSpec(
            num_scalar_prefetch=0,
            grid=(n,),
            in_specs=[vec_spec, vec_spec,
                      mat_spec, vec_spec,
                      mat_spec, vec_spec,
                      mat_spec, vec_spec,
                      mat_spec, vec_spec,
                      x_spec],
            out_specs=pl.BlockSpec((pl.Squeezed(), c, hw), lambda b: (b, 0, 0)),
        ),
        compiler_params=pltpu.CompilerParams(
            dimension_semantics=("parallel",)),
    )(*args)
    return out.reshape(n, c, h, w)


if __name__ == "__main__":
    key = jax.random.PRNGKey(0)
    keys = jax.random.split(key, 12)

    # GroupNorm(num_groups=32) requires C % 32 == 0 -> smallest valid C is 32.
    N, C, H, W = 2, 32, 16, 16
    x = jax.random.normal(keys[0], (N, C, H, W), dtype=jnp.float32)

    # PyTorch-like Conv2d(C, C, 1) init: uniform with bound 1/sqrt(fan_in), fan_in = C.
    bound = 1.0 / (C ** 0.5)

    def conv_init(kw_, kb_):
        wgt = jax.random.uniform(kw_, (C, C), minval=-bound, maxval=bound,
                                 dtype=jnp.float32)
        b = jax.random.uniform(kb_, (C,), minval=-bound, maxval=bound,
                               dtype=jnp.float32)
        return wgt, b

    wq, bq = conv_init(keys[1], keys[2])
    wk, bk = conv_init(keys[3], keys[4])
    wv, bv = conv_init(keys[5], keys[6])
    wp, bp = conv_init(keys[7], keys[8])
    # GroupNorm affine params (default is gamma=1, beta=0; perturb to exercise them).
    gamma = 1.0 + 0.1 * jax.random.uniform(keys[9], (C,), minval=-1.0, maxval=1.0,
                                           dtype=jnp.float32)
    beta = 0.05 * jax.random.normal(keys[10], (C,), dtype=jnp.float32)

    params = dict(gamma=gamma, beta=beta, wq=wq, bq=bq, wk=wk, bk=bk,
                  wv=wv, bv=bv, wp=wp, bp=bp)

    y = attn_block_forward(x, params)
    y = jax.block_until_ready(y)
    assert y.shape == (N, C, H, W), y.shape

    # ---- pure-JAX reference (same math as the PyTorch forward) ----
    hw = H * W
    xf = x.reshape(N, C, hw)
    xg = xf.reshape(N, 32, (C // 32) * hw)
    mean = jnp.mean(xg, axis=-1, keepdims=True)
    var = jnp.mean((xg - mean) ** 2, axis=-1, keepdims=True)
    hn = ((xg - mean) * jax.lax.rsqrt(var + 1e-6)).reshape(N, C, hw)
    hn = hn * gamma[None, :, None] + beta[None, :, None]
    hp = "highest"
    q = jnp.einsum("oc,ncs->nos", wq, hn, precision=hp) + bq[None, :, None]
    k = jnp.einsum("oc,ncs->nos", wk, hn, precision=hp) + bk[None, :, None]
    v = jnp.einsum("oc,ncs->nos", wv, hn, precision=hp) + bv[None, :, None]
    logits = jnp.einsum("nci,ncj->nij", q, k, precision=hp) * (C ** -0.5)
    attn = jax.nn.softmax(logits, axis=-1)
    h_att = jnp.einsum("ncj,nij->nci", v, attn, precision=hp)
    proj = jnp.einsum("oc,ncs->nos", wp, h_att, precision=hp) + bp[None, :, None]
    ref = x + proj.reshape(N, C, H, W)

    err = float(jnp.max(jnp.abs(y - ref)))
    # Tolerance covers MXU default-precision (bf16-pass) f32 matmuls in the kernel
    # vs. highest-precision reference; structural bugs would be O(1) errors.
    assert jnp.allclose(y, ref, atol=3e-2, rtol=3e-2), f"max abs err = {err}"

    print("KERNEL_OK")
</pallas_src>

<mosaic_0001>
module attributes {stable_mosaic.version = 11 : i64} {
  func.func @_attn_block_kernel(%arg0: i32, %arg1: memref<32x1xf32, #tpu.memory_space<vmem>>, %arg2: memref<32x1xf32, #tpu.memory_space<vmem>>, %arg3: memref<32x32xf32, #tpu.memory_space<vmem>>, %arg4: memref<32x1xf32, #tpu.memory_space<vmem>>, %arg5: memref<32x32xf32, #tpu.memory_space<vmem>>, %arg6: memref<32x1xf32, #tpu.memory_space<vmem>>, %arg7: memref<32x32xf32, #tpu.memory_space<vmem>>, %arg8: memref<32x1xf32, #tpu.memory_space<vmem>>, %arg9: memref<32x32xf32, #tpu.memory_space<vmem>>, %arg10: memref<32x1xf32, #tpu.memory_space<vmem>>, %arg11: memref<1x32x256xf32, #tpu.memory_space<vmem>>, %arg12: memref<1x32x256xf32, #tpu.memory_space<vmem>>) attributes {dimension_semantics = [#tpu.dimension_semantics<parallel>], iteration_bounds = array<i64: 2>, scalar_prefetch = 0 : i64, scratch_operands = 0 : i64, tpu.core_type = #tpu.core_type<tc>, window_params = [{pipeline_mode = #tpu.pipeline_mode<synchronous>, transform_indices = @transform_0, window_bounds = array<i64: 32, 1>}, {pipeline_mode = #tpu.pipeline_mode<synchronous>, transform_indices = @transform_1, window_bounds = array<i64: 32, 1>}, {pipeline_mode = #tpu.pipeline_mode<synchronous>, transform_indices = @transform_2, window_bounds = array<i64: 32, 32>}, {pipeline_mode = #tpu.pipeline_mode<synchronous>, transform_indices = @transform_3, window_bounds = array<i64: 32, 1>}, {pipeline_mode = #tpu.pipeline_mode<synchronous>, transform_indices = @transform_4, window_bounds = array<i64: 32, 32>}, {pipeline_mode = #tpu.pipeline_mode<synchronous>, transform_indices = @transform_5, window_bounds = array<i64: 32, 1>}, {pipeline_mode = #tpu.pipeline_mode<synchronous>, transform_indices = @transform_6, window_bounds = array<i64: 32, 32>}, {pipeline_mode = #tpu.pipeline_mode<synchronous>, transform_indices = @transform_7, window_bounds = array<i64: 32, 1>}, {pipeline_mode = #tpu.pipeline_mode<synchronous>, transform_indices = @transform_8, window_bounds = array<i64: 32, 32>}, {pipeline_mode = #tpu.pipeline_mode<synchronous>, transform_indices = @transform_9, window_bounds = array<i64: 32, 1>}, {transform_indices = @transform_10, window_bounds = array<i64: 1, 32, 256>}, {transform_indices = @transform_11, window_bounds = array<i64: 1, 32, 256>}]} {
    %c0 = arith.constant 0 : index
    %c0_0 = arith.constant 0 : index
    %c0_1 = arith.constant 0 : index
    %0 = vector.load %arg11[%c0, %c0_0, %c0_1] : memref<1x32x256xf32, #tpu.memory_space<vmem>>, vector<1x32x256xf32>
    %1 = vector.shape_cast %0 : vector<1x32x256xf32> to vector<32x256xf32>
    %cst = arith.constant dense<0.000000e+00> : vector<32xf32>
    %2 = vector.multi_reduction <add>, %1, %cst [1] : vector<32x256xf32> to vector<32xf32>
    %3 = vector.shape_cast %2 : vector<32xf32> to vector<32x1xf32>
    %cst_2 = arith.constant 2.560000e+02 : f32
    %4 = vector.broadcast %cst_2 : f32 to vector<32x1xf32>
    %5 = arith.divf %3, %4 : vector<32x1xf32>
    %6 = vector.broadcast %5 : vector<32x1xf32> to vector<32x256xf32>
    %7 = arith.subf %1, %6 : vector<32x256xf32>
    %8 = arith.mulf %7, %7 : vector<32x256xf32>
    %cst_3 = arith.constant dense<0.000000e+00> : vector<32xf32>
    %9 = vector.multi_reduction <add>, %8, %cst_3 [1] : vector<32x256xf32> to vector<32xf32>
    %10 = vector.shape_cast %9 : vector<32xf32> to vector<32x1xf32>
    %cst_4 = arith.constant 2.560000e+02 : f32
    %11 = vector.broadcast %cst_4 : f32 to vector<32x1xf32>
    %12 = arith.divf %10, %11 : vector<32x1xf32>
    %cst_5 = arith.constant 9.99999997E-7 : f32
    %13 = vector.broadcast %cst_5 : f32 to vector<32x1xf32>
    %14 = arith.addf %12, %13 : vector<32x1xf32>
    %15 = math.rsqrt %14 : vector<32x1xf32>
    %16 = vector.broadcast %15 : vector<32x1xf32> to vector<32x256xf32>
    %17 = arith.mulf %7, %16 : vector<32x256xf32>
    %c0_6 = arith.constant 0 : index
    %c0_7 = arith.constant 0 : index
    %18 = vector.load %arg1[%c0_6, %c0_7] : memref<32x1xf32, #tpu.memory_space<vmem>>, vector<32x1xf32>
    %19 = vector.broadcast %18 : vector<32x1xf32> to vector<32x256xf32>
    %20 = arith.mulf %17, %19 : vector<32x256xf32>
    %c0_8 = arith.constant 0 : index
    %c0_9 = arith.constant 0 : index
    %21 = vector.load %arg2[%c0_8, %c0_9] : memref<32x1xf32, #tpu.memory_space<vmem>>, vector<32x1xf32>
    %22 = vector.broadcast %21 : vector<32x1xf32> to vector<32x256xf32>
    %23 = arith.addf %20, %22 : vector<32x256xf32>
    %c0_10 = arith.constant 0 : index
    %c0_11 = arith.constant 0 : index
    %24 = vector.load %arg3[%c0_10, %c0_11] : memref<32x32xf32, #tpu.memory_space<vmem>>, vector<32x32xf32>
    %cst_12 = arith.constant dense<0.000000e+00> : vector<32x256xf32>
    %25 = tpu.matmul %24, %23, %cst_12 {dimension_numbers = #tpu.dot_dimension_numbers<[1], [0], [0], [1], [0, 0, 1, 1], [], []>} : vector<32x32xf32>, vector<32x256xf32>, vector<32x256xf32> -> vector<32x256xf32>
    %c0_13 = arith.constant 0 : index
    %c0_14 = arith.constant 0 : index
    %26 = vector.load %arg4[%c0_13, %c0_14] : memref<32x1xf32, #tpu.memory_space<vmem>>, vector<32x1xf32>
    %27 = vector.broadcast %26 : vector<32x1xf32> to vector<32x256xf32>
    %28 = arith.addf %25, %27 : vector<32x256xf32>
    %c0_15 = arith.constant 0 : index
    %c0_16 = arith.constant 0 : index
    %29 = vector.load %arg5[%c0_15, %c0_16] : memref<32x32xf32, #tpu.memory_space<vmem>>, vector<32x32xf32>
    %cst_17 = arith.constant dense<0.000000e+00> : vector<32x256xf32>
    %30 = tpu.matmul %29, %23, %cst_17 {dimension_numbers = #tpu.dot_dimension_numbers<[1], [0], [0], [1], [0, 0, 1, 1], [], []>} : vector<32x32xf32>, vector<32x256xf32>, vector<32x256xf32> -> vector<32x256xf32>
    %c0_18 = arith.constant 0 : index
    %c0_19 = arith.constant 0 : index
    %31 = vector.load %arg6[%c0_18, %c0_19] : memref<32x1xf32, #tpu.memory_space<vmem>>, vector<32x1xf32>
    %32 = vector.broadcast %31 : vector<32x1xf32> to vector<32x256xf32>
    %33 = arith.addf %30, %32 : vector<32x256xf32>
    %c0_20 = arith.constant 0 : index
    %c0_21 = arith.constant 0 : index
    %34 = vector.load %arg7[%c0_20, %c0_21] : memref<32x32xf32, #tpu.memory_space<vmem>>, vector<32x32xf32>
    %cst_22 = arith.constant dense<0.000000e+00> : vector<32x256xf32>
    %35 = tpu.matmul %34, %23, %cst_22 {dimension_numbers = #tpu.dot_dimension_numbers<[1], [0], [0], [1], [0, 0, 1, 1], [], []>} : vector<32x32xf32>, vector<32x256xf32>, vector<32x256xf32> -> vector<32x256xf32>
    %c0_23 = arith.constant 0 : index
    %c0_24 = arith.constant 0 : index
    %36 = vector.load %arg8[%c0_23, %c0_24] : memref<32x1xf32, #tpu.memory_space<vmem>>, vector<32x1xf32>
    %37 = vector.broadcast %36 : vector<32x1xf32> to vector<32x256xf32>
    %38 = arith.addf %35, %37 : vector<32x256xf32>
    %cst_25 = arith.constant dense<0.000000e+00> : vector<256x256xf32>
    %39 = tpu.matmul %28, %33, %cst_25 {dimension_numbers = #tpu.dot_dimension_numbers<[0], [0], [1], [1], [0, 1, 1, 1], [], []>} : vector<32x256xf32>, vector<32x256xf32>, vector<256x256xf32> -> vector<256x256xf32>
    %cst_26 = arith.constant 0.176776692 : f32
    %40 = vector.broadcast %cst_26 : f32 to vector<256x256xf32>
    %41 = arith.mulf %39, %40 : vector<256x256xf32>
    %cst_27 = arith.constant dense<0xFF800000> : vector<256xf32>
    %42 = vector.multi_reduction <maximumf>, %41, %cst_27 [1] : vector<256x256xf32> to vector<256xf32>
    %43 = vector.shape_cast %42 : vector<256xf32> to vector<256x1xf32>
    %44 = vector.broadcast %43 : vector<256x1xf32> to vector<256x256xf32>
    %45 = arith.subf %41, %44 : vector<256x256xf32>
    %46 = math.exp %45 : vector<256x256xf32>
    %cst_28 = arith.constant dense<0.000000e+00> : vector<256xf32>
    %47 = vector.multi_reduction <add>, %46, %cst_28 [1] : vector<256x256xf32> to vector<256xf32>
    %48 = vector.shape_cast %47 : vector<256xf32> to vector<256x1xf32>
    %49 = vector.broadcast %48 : vector<256x1xf32> to vector<256x256xf32>
    %50 = arith.divf %46, %49 : vector<256x256xf32>
    %cst_29 = arith.constant dense<0.000000e+00> : vector<32x256xf32>
    %51 = tpu.matmul %38, %50, %cst_29 {dimension_numbers = #tpu.dot_dimension_numbers<[1], [1], [0], [0], [0, 0, 1, 0], [], []>} : vector<32x256xf32>, vector<256x256xf32>, vector<32x256xf32> -> vector<32x256xf32>
    %c0_30 = arith.constant 0 : index
    %c0_31 = arith.constant 0 : index
    %52 = vector.load %arg9[%c0_30, %c0_31] : memref<32x32xf32, #tpu.memory_space<vmem>>, vector<32x32xf32>
    %cst_32 = arith.constant dense<0.000000e+00> : vector<32x256xf32>
    %53 = tpu.matmul %52, %51, %cst_32 {dimension_numbers = #tpu.dot_dimension_numbers<[1], [0], [0], [1], [0, 0, 1, 1], [], []>} : vector<32x32xf32>, vector<32x256xf32>, vector<32x256xf32> -> vector<32x256xf32>
    %c0_33 = arith.constant 0 : index
    %c0_34 = arith.constant 0 : index
    %54 = vector.load %arg10[%c0_33, %c0_34] : memref<32x1xf32, #tpu.memory_space<vmem>>, vector<32x1xf32>
    %55 = vector.broadcast %54 : vector<32x1xf32> to vector<32x256xf32>
    %56 = arith.addf %53, %55 : vector<32x256xf32>
    %57 = arith.addf %1, %56 : vector<32x256xf32>
    %c0_35 = arith.constant 0 : index
    %c0_36 = arith.constant 0 : index
    %c0_37 = arith.constant 0 : index
    %58 = vector.load %arg12[%c0_35, %c0_36, %c0_37] : memref<1x32x256xf32, #tpu.memory_space<vmem>>, vector<1x32x256xf32>
    %59 = vector.shape_cast %58 : vector<1x32x256xf32> to vector<32x256xf32>
    %60 = vector.shape_cast %57 : vector<32x256xf32> to vector<1x32x256xf32>
    tpu.vector_store %arg12[%c0_35, %c0_36, %c0_37], %60 {strides = array<i32>} : memref<1x32x256xf32, #tpu.memory_space<vmem>>, vector<1x32x256xf32>,
    return
  }
  func.func @transform_0(%arg0: i32) -> (i32, i32) {
    %c0_i32 = arith.constant 0 : i32
    %c0_i32_0 = arith.constant 0 : i32
    %c0_i32_1 = arith.constant 0 : i32
    return %c0_i32, %c0_i32_0 : i32, i32
  }
  func.func @transform_1(%arg0: i32) -> (i32, i32) {
    %c0_i32 = arith.constant 0 : i32
    %c0_i32_0 = arith.constant 0 : i32
    %c0_i32_1 = arith.constant 0 : i32
    return %c0_i32, %c0_i32_0 : i32, i32
  }
  func.func @transform_2(%arg0: i32) -> (i32, i32) {
    %c0_i32 = arith.constant 0 : i32
    %c0_i32_0 = arith.constant 0 : i32
    %c0_i32_1 = arith.constant 0 : i32
    return %c0_i32, %c0_i32_0 : i32, i32
  }
  func.func @transform_3(%arg0: i32) -> (i32, i32) {
    %c0_i32 = arith.constant 0 : i32
    %c0_i32_0 = arith.constant 0 : i32
    %c0_i32_1 = arith.constant 0 : i32
    return %c0_i32, %c0_i32_0 : i32, i32
  }
  func.func @transform_4(%arg0: i32) -> (i32, i32) {
    %c0_i32 = arith.constant 0 : i32
    %c0_i32_0 = arith.constant 0 : i32
    %c0_i32_1 = arith.constant 0 : i32
    return %c0_i32, %c0_i32_0 : i32, i32
  }
  func.func @transform_5(%arg0: i32) -> (i32, i32) {
    %c0_i32 = arith.constant 0 : i32
    %c0_i32_0 = arith.constant 0 : i32
    %c0_i32_1 = arith.constant 0 : i32
    return %c0_i32, %c0_i32_0 : i32, i32
  }
  func.func @transform_6(%arg0: i32) -> (i32, i32) {
    %c0_i32 = arith.constant 0 : i32
    %c0_i32_0 = arith.constant 0 : i32
    %c0_i32_1 = arith.constant 0 : i32
    return %c0_i32, %c0_i32_0 : i32, i32
  }
  func.func @transform_7(%arg0: i32) -> (i32, i32) {
    %c0_i32 = arith.constant 0 : i32
    %c0_i32_0 = arith.constant 0 : i32
    %c0_i32_1 = arith.constant 0 : i32
    return %c0_i32, %c0_i32_0 : i32, i32
  }
  func.func @transform_8(%arg0: i32) -> (i32, i32) {
    %c0_i32 = arith.constant 0 : i32
    %c0_i32_0 = arith.constant 0 : i32
    %c0_i32_1 = arith.constant 0 : i32
    return %c0_i32, %c0_i32_0 : i32, i32
  }
  func.func @transform_9(%arg0: i32) -> (i32, i32) {
    %c0_i32 = arith.constant 0 : i32
    %c0_i32_0 = arith.constant 0 : i32
    %c0_i32_1 = arith.constant 0 : i32
    return %c0_i32, %c0_i32_0 : i32, i32
  }
  func.func @transform_10(%arg0: i32) -> (i32, i32, i32) {
    %c0_i32 = arith.constant 0 : i32
    %c0_i32_0 = arith.constant 0 : i32
    %c0_i32_1 = arith.constant 0 : i32
    return %arg0, %c0_i32, %c0_i32_0 : i32, i32, i32
  }
  func.func @transform_11(%arg0: i32) -> (i32, i32, i32) {
    %c0_i32 = arith.constant 0 : i32
    %c0_i32_0 = arith.constant 0 : i32
    %c0_i32_1 = arith.constant 0 : i32
    return %arg0, %c0_i32, %c0_i32_0 : i32, i32, i32
  }
}

</mosaic_0001>

<bundles_post_ra>
// kernel: tpu_custom_call.1
= control target key start
LH: loop header
LB: loop body
LE: loop exit
PB: predicated region body
PF: predicated region fallthrough
CT: control target
= control target key end

     0   :  { %s3758_s0 = inlined_call_operand.vmem [shape: f32[32,1], index: 0, kind: input, shape index: {}]   ;;  %s3759_s1 = inlined_call_operand.vmem [shape: f32[32,1], index: 1, kind: input, shape index: {}]   ;;  %s3760_s2 = inlined_call_operand.vmem [shape: f32[32,32], index: 2, kind: input, shape index: {}]   ;;  %s3761_s3 = inlined_call_operand.vmem [shape: f32[32,1], index: 3, kind: input, shape index: {}]   ;;  %s3762_s4 = inlined_call_operand.vmem [shape: f32[32,32], index: 4, kind: input, shape index: {}]   ;;  %s3763_s5 = inlined_call_operand.vmem [shape: f32[32,1], index: 5, kind: input, shape index: {}]   ;;  %s3764_s6 = inlined_call_operand.hbm [shape: f32[32,32], index: 6, kind: input, shape index: {}]   ;;  %s3765_s7 = inlined_call_operand.vmem [shape: f32[32,1], index: 7, kind: input, shape index: {}]   ;;  %s3766_s8 = inlined_call_operand.hbm [shape: f32[32,32], index: 8, kind: input, shape index: {}]   ;;  %s3767_s9 = inlined_call_operand.vmem [shape: f32[32,1], index: 9, kind: input, shape index: {}]   ;;  %s3768_s10 = inlined_call_operand.vmem [shape: f32[2,32,256], index: 10, kind: input, shape index: {}]   ;;  %s3769_s11 = inlined_call_operand.hbm [shape: f32[2,32,256], index: 11, kind: output, shape index: {}]  }
   0x1   :  { %3799 = sst [smem:[#allocation27_spill]] %s3758_s0 }
   0x2   :  { %16 = vsyncpa [#allocation3], 0 }
   0x3   :  { %17 = vsyncpa [#allocation6], 0 }
   0x4   :  { %18 = vsyncpa [#allocation4], 0 }
   0x5   :  { %20 = vsyncpa [#allocation4 + $0x1], 0  ;;  %s2766_s17 = smov 0   ;;  %s2768_s18 = smov 0  }
   0x6   :  { %s2770_s19 = smov 0   ;;  %s2772_s20 = smov 0  }
   0x7 LB: > { %s2787_s21 = sadd.s32 4294967295, %s2695_s20   ;;  %s2233_s22 = sadd.s32 4294967294, %s2695_s20   ;;  %s2695_s20 = sphi %s2772_s20, %s3867_s20   ;;  %s2691_s19 = sphi %s2770_s19, %s3866_s19   ;;  %s2687_s18 = sphi %s2768_s18, %s3865_s18   ;;  %s2683_s17 = sphi %s2766_s17, %s3864_s17  }
   0x8   : > { %s2791_s23 = sadd.s32 1, %s2695_s20   ;;  %s269_s24 = sadd.s32 1, %s2691_s19 }
   0x9   : > { %s266_s25 = ssub.s32 %s2695_s20, %s2791_s23  ;;  %p279_p0 = scmp.ne.s32.totalorder %s2691_s19, %s2687_s18 }
   0xa   : > { %p267_p1 = scmp.eq.s32.totalorder %s266_s25, 0  ;;  %p280_p2 = scmp.eq.s32.totalorder %s2787_s21, 1 }
   0xb   : > { %p285_p3 = scmp.ne.s32.totalorder %s2687_s18, %s2683_s17  ;;  %p286_p4 = scmp.eq.s32.totalorder %s2233_s22, 1 }
   0xc   : > { %s2802_s26 = scalar_select %p267_p1, %s2691_s19, %s269_s24  }
   0xd   : > { %p2804_p5 = por %p280_p2, %p279_p0  ;;  %p2808_p6 = por %p286_p4, %p285_p3 }
   0xe   : > { %3800 = sst [smem:[#allocation11_spill]] %s2802_s26  ;;  %p2234_p7 = scmp.ge.s32.totalorder %s2695_s20, 1 }
   0xf   : > { %s3802_s28 = scalar_select %p2808_p6, 1, 0 }
  0x10   : > { %p293_p8 = scmp.lt.s32.totalorder %s2695_s20, 3  ;;  %p3770_p9 = scmp.eq.s32.totalorder %s2787_s21, 0 }
  0x11   : > { %s2697_s30 = smov [#allocation2]   ;;  %s2698_s14 = smov [#allocation5]  }
  0x12   : > { %p2815_p10 = pnand %p2234_p7, %p293_p8  ;;  %s323_s12 = sshll.u32 %s2697_s30, 4  ;;  %s324_s12 = int_to_ptr.vmem [resolvable:$true] %s323_s12 }
  0x13   : > { %s339_s15 = sshll.u32 %s2698_s14, 4  ;;  %s2586_s16 = scalar_lea.vmem %s324_s12, 512  ;;  %s340_s15 = int_to_ptr.vmem [resolvable:$true] %s339_s15 }
  0x14   : > { %p2309_p11 = pneg %p2815_p10  ;;  %p2587_p0 = scmp.ne.s32.totalorder %s324_s12, %s2586_s16 }
  0x15   : > { %p2594_p3 = scmp.lt.s32.totalorder %s324_s12, %s324_s12  ;;  %p2595_p4 = scmp.lt.s32.totalorder %s2586_s16, %s2586_s16 }
  0x16   : > { %p2823_p12 = pnand %p3770_p9, %p2309_p11 }
  0x17   : > { %p2596_p7 = por %p2595_p4, %p2594_p3 }
  0x18   : > { %p2577_p13 = pneg %p2823_p12 }
  0x1a   : > { %p2589_p1 = pnand %p2587_p0, %p2577_p13 }
  0x1c   : > { %p2590_p2 = pneg %p2589_p1 }
  0x1e   : > { %p2597_p8 = pnand %p2596_p7, %p2590_p2 }
  0x20   : > { %2600 = shalt.err (!%p2597_p8)
}
  0x21   : > { %s2699_s22 = smov 128   ;;  %s2700_s24 = smov 8  }
  0x22   : > { %2312 = dma.hbm_to_vmem [thread:$0]  (!%p2823_p12), %s3764_s6, 512, %s324_s12, [#allocation3], %s2699_s22, %s2699_s22, %s2700_s24  }
  0x23   : > { %s2612_s14 = scalar_lea.vmem %s340_s15, 512  ;;  %p2620_p9 = scmp.lt.s32.totalorder %s340_s15, %s340_s15 }
  0x24   : > { %p2613_p11 = scmp.ne.s32.totalorder %s340_s15, %s2612_s14  ;;  %p2621_p6 = scmp.lt.s32.totalorder %s2612_s14, %s2612_s14 }
  0x26   : > { %p2615_p0 = pnand %p2613_p11, %p2577_p13  ;;  %p2622_p3 = por %p2621_p6, %p2620_p9 }
  0x28   : > { %p2616_p1 = pneg %p2615_p0 }
  0x2a   : > { %p2623_p2 = pnand %p2622_p3, %p2616_p1 }
  0x2c   : > { %2626 = shalt.err (!%p2623_p2)
}
  0x2d   : > { %2315 = dma.hbm_to_vmem [thread:$0]  (!%p2823_p12), %s3766_s8, 512, %s340_s15, [#allocation6], %s2699_s22, %s2699_s22, %s2700_s24  }
  0x2e   : > { %366 = sbr.rel (%p2815_p10) target bundleno = 1914 (0x77a), region = 64 }
  0x33   : > { %p3805_p4 = scmp.eq.s32.totalorder %s2787_s21, 0 }
  0x35   : > { %2670 = dma.done.wait (%p3805_p4), [#allocation3], 512   ;;  %p3806_p13 = pmov %p3805_p4 }
  0x36   : > { %p3807_p7 = pmov %p3805_p4 }
  0x37   : > { %2672 = vsyncadd (%p3806_p13), [#allocation3], 4294966784 }
  0x38   : > { %2674 = dma.done.wait (%p3807_p7), [#allocation6], 512   ;;  %p3808_p6 = pmov %p3805_p4 }
  0x39   : > { %p410_p9 = scmp.lt.s32.totalorder %s2787_s21, 1  ;;  %v2701_v12 = vmov 0   ;;  %s3809_s0 = sld [smem:[#allocation27_spill]]  ;;  %v523_v35 = vld [vmem:[%s3759_s1 + $0x18] sm:$0xff]  ;;  %v557_v38 = vld [vmem:[%s3761_s3 + $0x8] sm:$0xff]  ;;  %v522_v39 = vld [vmem:[%s3759_s1 + $0x10] sm:$0xff] }
  0x3a   : > { %2676 = vsyncadd (%p3808_p6), [#allocation6], 4294966784  ;;  %2366 = vset.pattern.permute.xlu1 %v2701_v12  ;;  %2365 = vset.pattern.permute.xlu0 %v2701_v12  ;;  %v559_v40 = vld [vmem:[%s3761_s3 + $0x18] sm:$0xff]  ;;  %v688_v42 = vld [vmem:[%s3763_s5 + $0x10] sm:$0xff]  ;;  %v3771_v57 = vmov 0.0   ;;  %vm580_vm0 = vcmask 261120  }
  0x3b   : > { %s411_s26 = scalar_select %p410_p9, %s2787_s21, 1  ;;  %v521_v43 = vld [vmem:[%s3759_s1 + $0x8] sm:$0xff]  ;;  %v686_v44 = vld [vmem:[%s3763_s5] sm:$0xff]  ;;  %v558_v54 = vld [vmem:[%s3761_s3 + $0x10] sm:$0xff]  ;;  %657 = vmatprep.mubr.f32.mxu0 %v3771_v57  ;;  %786 = vmatprep.mubr.f32.mxu1 %v3771_v57 }
  0x3c   : > { %v520_v52 = vld [vmem:[%s3759_s1] sm:$0xff]  ;;  %v689_v55 = vld [vmem:[%s3763_s5 + $0x18] sm:$0xff]  ;;  %v687_v56 = vld [vmem:[%s3763_s5 + $0x8] sm:$0xff]  ;;  %s407_s14 = sand.u32 1, %s2687_s18   ;;  %s2298_s13 = sshll.u32 %s2787_s21, 10 }
  0x3d   : > { %s2297_s12 = sshll.u32 %s411_s26, 6  ;;  %v556_v53 = vld [vmem:[%s3761_s3] sm:$0xff]  ;;  %s2241_s16 = sshll.u32 %s407_s14, 6 }
  0x3e   : > { %s2860_s15 = scalar_lea.vmem %s3768_s10, %s2297_s12  ;;  %s3690_s26 = scalar_lea.vmem [#allocation7], %s2241_s16 }
  0x3f   : > { %v421_v0 = vld [vmem:[%s2860_s15 + $0x30] sm:$0xff]  ;;  %v422_v1 = vld [vmem:[%s2860_s15 + $0x38] sm:$0xff]  ;;  %v419_v2 = vld [vmem:[%s2860_s15 + $0x20] sm:$0xff]  ;;  %s2149_s12 = sshll.u32 %s3690_s26, 4  ;;  %s3713_s24 = scalar_lea.hbm %s3769_s11, %s2298_s13  ;;  %s3706_s12 = int_to_ptr.vmem [resolvable:$true] %s2149_s12 }
  0x40   : > { %v432_v3 = vadd.f32 %v422_v1, %v421_v0  ;;  %v420_v4 = vld [vmem:[%s2860_s15 + $0x28] sm:$0xff]  ;;  %v417_v5 = vld [vmem:[%s2860_s15 + $0x10] sm:$0xff]  ;;  %v418_v6 = vld [vmem:[%s2860_s15 + $0x18] sm:$0xff]  ;;  %s3718_s21 = scalar_lea.sflag [#allocation4], %s407_s14  ;;  %s2627_s25 = scalar_lea.vmem %s3706_s12, 1024 }
  0x41   : > { %v426_v7 = vadd.f32 %v418_v6, %v417_v5  ;;  %v415_v8 = vld [vmem:[%s2860_s15] sm:$0xff]  ;;  %v416_v9 = vld [vmem:[%s2860_s15 + $0x8] sm:$0xff]  ;;  %v429_v10 = vadd.f32 %v420_v4, %v419_v2  ;;  %v490_v34 = vld [vmem:[%s3809_s0 + $0x10] sm:$0xff]  ;;  %p2628_p10 = scmp.ne.s32.totalorder %s3706_s12, %s2627_s25  ;;  %s2703_s30 = smov [#allocation7]  }
  0x42   : > { %433 = vadd.xlane.f32.xlu0 %v432_v3  ;;  %v423_v11 = vadd.f32 %v416_v9, %v415_v8  ;;  %v491_v36 = vld [vmem:[%s3809_s0 + $0x18] sm:$0xff]  ;;  %v489_v37 = vld [vmem:[%s3809_s0 + $0x8] sm:$0xff]  ;;  %v488_v41 = vld [vmem:[%s3809_s0] sm:$0xff]  ;;  %s2631_s16 = sshll.u32 %s2703_s30, 4  ;;  %s2632_s16 = int_to_ptr.vmem [resolvable:$false] %s2631_s16 }
  0x43   : > { %427 = vadd.xlane.f32.xlu1 %v426_v7  ;;  %p2629_p12 = pnand %p2628_p10, %p2804_p5  ;;  %s2633_s0 = scalar_lea.vmem %s2632_s16, 2048 }
  0x44   : > { %p2634_p11 = scmp.lt.s32.totalorder %s3706_s12, %s2632_s16  ;;  %p2635_p0 = scmp.lt.s32.totalorder %s2633_s0, %s2627_s25 }
  0x45   : > { %p2630_p8 = pneg %p2629_p12 }
  0x46   : > { %430 = vadd.xlane.f32.xlu0 %v429_v10  ;;  %p2636_p1 = por %p2635_p0, %p2634_p11 }
  0x47   : > { %424 = vadd.xlane.f32.xlu1 %v423_v11 }
  0x48   : > { %p2637_p3 = pnand %p2636_p1, %p2630_p8 }
  0xcb   : > { %v434_v13 = vpop.xlane.xlu0 %433 }
  0xcc   : > { %v439_v14 = vmul.f32 0.00390625, %v434_v13  ;;  %v428_v15 = vpop.xlane.xlu1 %427 }
  0xcd   : > { %v437_v16 = vmul.f32 0.00390625, %v428_v15 }
  0xce   : > { %v2870_v17 = vsub.f32 %v421_v0, %v439_v14  ;;  %v2872_v18 = vsub.f32 %v422_v1, %v439_v14 }
  0xcf   : > { %v431_v19 = vpop.xlane.xlu0 %430  ;;  %v2874_v20 = vsub.f32 %v417_v5, %v437_v16  ;;  %v2876_v21 = vsub.f32 %v418_v6, %v437_v16 }
  0xd0   : > { %v438_v22 = vmul.f32 0.00390625, %v431_v19  ;;  %v454_v23 = vmul.f32 %v2870_v17, %v2870_v17  ;;  %v455_v24 = vmul.f32 %v2872_v18, %v2872_v18  ;;  %v425_v45 = vpop.xlane.xlu1 %424 }
  0xd1   : > { %v450_v25 = vmul.f32 %v2874_v20, %v2874_v20  ;;  %v451_v26 = vmul.f32 %v2876_v21, %v2876_v21  ;;  %v436_v46 = vmul.f32 0.00390625, %v425_v45  ;;  %v553_v45 = vld [vmem:[%s3760_s2 + $0x8] sm:$0xff] }
  0xd2   : > { %v2886_v27 = vsub.f32 %v419_v2, %v438_v22  ;;  %v2888_v28 = vsub.f32 %v420_v4, %v438_v22  ;;  %v465_v29 = vadd.f32 %v455_v24, %v454_v23 }
  0xd3   : > { %v459_v30 = vadd.f32 %v451_v26, %v450_v25  ;;  %v2927_v47 = vsub.f32 %v415_v8, %v436_v46  ;;  %v2929_v48 = vsub.f32 %v416_v9, %v436_v46  ;;  %v684_v46 = vld [vmem:[%s3762_s4 + $0x10] sm:$0xff] }
  0xd4   : > { %466 = vadd.xlane.f32.xlu0 %v465_v29  ;;  %v452_v31 = vmul.f32 %v2886_v27, %v2886_v27  ;;  %v453_v32 = vmul.f32 %v2888_v28, %v2888_v28 }
  0xd5   : > { %v448_v49 = vmul.f32 %v2927_v47, %v2927_v47  ;;  %v449_v50 = vmul.f32 %v2929_v48, %v2929_v48 }
  0xd6   : > { %v462_v33 = vadd.f32 %v453_v32, %v452_v31 }
  0xd7   : > { %v456_v51 = vadd.f32 %v449_v50, %v448_v49  ;;  %v555_v49 = vld [vmem:[%s3760_s2 + $0x18] sm:$0xff] }
  0xd8   : > { %460 = vadd.xlane.f32.xlu0 %v459_v30  ;;  %463 = vadd.xlane.f32.xlu1 %v462_v33 }
  0xe9   : > { %504 = vperm.xlu1 %2366, %v490_v34  }
  0xed   : > { %541 = vperm.xlu1 %2366, %v523_v35  }
  0xee   : > { %509 = vperm.xlu0 %2365, %v491_v36  }
  0xf1   : > { %499 = vperm.xlu1 %2366, %v489_v37  }
  0xf2   : > { %567 = vperm.xlu0 %2365, %v557_v38  }
  0xf5   : > { %536 = vperm.xlu1 %2366, %v522_v39  }
  0xf6   : > { %577 = vperm.xlu0 %2365, %v559_v40  }
  0xf9   : > { %494 = vperm.xlu1 %2366, %v488_v41  }
  0xfa   : > { %702 = vperm.xlu0 %2365, %v688_v42   ;;  %v552_v42 = vld [vmem:[%s3760_s2] sm:$0xff] }
  0xfd   : > { %531 = vperm.xlu1 %2366, %v521_v43   ;;  %v682_v43 = vld [vmem:[%s3762_s4] sm:$0xff] }
  0xfe   : > { %692 = vperm.xlu0 %2365, %v686_v44   ;;  %v683_v44 = vld [vmem:[%s3762_s4 + $0x8] sm:$0xff] }
 0x121   : > { %457 = vadd.xlane.f32.xlu1 %v456_v51 }
 0x132   : > { %526 = vperm.xlu1 %2366, %v520_v52  }
 0x136   : > { %562 = vperm.xlu1 %2366, %v556_v53  }
 0x13a   : > { %572 = vperm.xlu1 %2366, %v558_v54  }
 0x13e   : > { %707 = vperm.xlu1 %2366, %v689_v55  }
 0x142   : > { %697 = vperm.xlu1 %2366, %v687_v56  }
 0x15d   : > { %v467_v58 = vpop.xlane.xlu0 %466 }
 0x15e   : > { %v471_v59 = vmul.f32 0.00390625, %v467_v58 }
 0x160   : > { %v475_v60 = vadd.f32 1e-06, %v471_v59 }
 0x161   : > { %v461_v61 = vpop.xlane.xlu0 %460  ;;  %v464_v62 = vpop.xlane.xlu1 %463 }
 0x162   : > { %2367 = vrsqrt.f32 %v475_v60  ;;  %v469_v63 = vmul.f32 0.00390625, %v461_v61  ;;  %v470_v0 = vmul.f32 0.00390625, %v464_v62 }
 0x164   : > { %v473_v1 = vadd.f32 1e-06, %v469_v63  ;;  %v474_v2 = vadd.f32 1e-06, %v470_v0 }
 0x165   : > { %v505_v3 = vpop.permute.xlu1 %504 }
 0x166   : > { %2369 = vrsqrt.f32 %v473_v1 }
 0x167   : > { %2371 = vrsqrt.f32 %v474_v2 }
 0x169   : > { %v542_v4 = vpop.permute.xlu1 %541  ;;  %v510_v7 = vpop.permute.xlu0 %509 }
 0x16d   : > { %v500_v5 = vpop.permute.xlu1 %499  ;;  %v568_v53 = vpop.permute.xlu0 %567 }
 0x16f   : > { %v2368_v6 = vpop.eup %2367 }
 0x170   : > { %v486_v8 = vmul.f32 %v2368_v6, %v2870_v17  ;;  %v487_v9 = vmul.f32 %v2368_v6, %v2872_v18 }
 0x171   : > { %v537_v10 = vpop.permute.xlu1 %536  ;;  %v578_v1 = vpop.permute.xlu0 %577 }
 0x172   : > { %v518_v11 = vmul.f32 %v510_v7, %v486_v8  ;;  %v519_v12 = vmul.f32 %v510_v7, %v487_v9 }
 0x173   : > { %v2370_v13 = vpop.eup %2369 }
 0x174   : > { %v2372_v14 = vpop.eup %2371  ;;  %v482_v15 = vmul.f32 %v2370_v13, %v2874_v20  ;;  %v483_v16 = vmul.f32 %v2370_v13, %v2876_v21  ;;  %v551_v19 = vadd.f32 %v542_v4, %v519_v12  ;;  %v550_v22 = vadd.f32 %v542_v4, %v518_v11 }
 0x175   : > { %v484_v23 = vmul.f32 %v2372_v14, %v2886_v27  ;;  %v485_v24 = vmul.f32 %v2372_v14, %v2888_v28  ;;  %v495_v25 = vpop.permute.xlu1 %494  ;;  %v703_v12 = vpop.permute.xlu0 %702 }
 0x176   : > { %617 = vmatprep.subr.mxu0 %v551_v19  ;;  %746 = vmatprep.subr.mxu1 %v551_v19  ;;  %v514_v26 = vmul.f32 %v500_v5, %v482_v15  ;;  %v515_v29 = vmul.f32 %v500_v5, %v483_v16 }
 0x177   : > { %v516_v17 = vmul.f32 %v505_v3, %v484_v23  ;;  %v517_v18 = vmul.f32 %v505_v3, %v485_v24  ;;  %618 = vmatpush1.msra.mxu0 %v550_v22  ;;  %747 = vmatpush1.msra.mxu1 %v550_v22 }
 0x179   : > { %v548_v30 = vadd.f32 %v537_v10, %v516_v17  ;;  %v549_v31 = vadd.f32 %v537_v10, %v517_v18  ;;  %v532_v20 = vpop.permute.xlu1 %531  ;;  %v693_v18 = vpop.permute.xlu0 %692 }
 0x17a   : > { %v546_v32 = vadd.f32 %v532_v20, %v514_v26  ;;  %v547_v21 = vadd.f32 %v532_v20, %v515_v29 }
 0x17b   : > { %619 = vmatprep.subr.mxu0 %v549_v31  ;;  %748 = vmatprep.subr.mxu1 %v549_v31 }
 0x17c   : > { %620 = vmatpush1.msra.mxu0 %v548_v30  ;;  %749 = vmatpush1.msra.mxu1 %v548_v30 }
 0x17d   : > { %621 = vmatprep.subr.mxu0 %v547_v21  ;;  %750 = vmatprep.subr.mxu1 %v547_v21 }
 0x17e   : > { %622 = vmatpush1.msra.mxu0 %v546_v32  ;;  %751 = vmatpush1.msra.mxu1 %v546_v32 }
 0x1aa   : > { %v458_v27 = vpop.xlane.xlu1 %457 }
 0x1ab   : > { %v468_v28 = vmul.f32 0.00390625, %v458_v27 }
 0x1ad   : > { %v472_v33 = vadd.f32 1e-06, %v468_v28 }
 0x1ae   : > { %v527_v39 = vpop.permute.xlu1 %526 }
 0x1af   : > { %2373 = vrsqrt.f32 %v472_v33 }
 0x1b2   : > { %v563_v50 = vpop.permute.xlu1 %562 }
 0x1b6   : > { %v573_v61 = vpop.permute.xlu1 %572 }
 0x1ba   : > { %v708_v8 = vpop.permute.xlu1 %707 }
 0x1bc   : > { %v2374_v34 = vpop.eup %2373 }
 0x1bd   : > { %v480_v35 = vmul.f32 %v2374_v34, %v2927_v47  ;;  %v481_v36 = vmul.f32 %v2374_v34, %v2929_v48  ;;  %v554_v47 = vld [vmem:[%s3760_s2 + $0x10] sm:$0xff]  ;;  %v685_v48 = vld [vmem:[%s3762_s4 + $0x18] sm:$0xff] }
 0x1be   : > { %v698_v24 = vpop.permute.xlu1 %697 }
 0x1bf   : > { %v512_v37 = vmul.f32 %v495_v25, %v480_v35  ;;  %v513_v38 = vmul.f32 %v495_v25, %v481_v36 }
 0x1c1   : > { %v544_v40 = vadd.f32 %v527_v39, %v512_v37  ;;  %v545_v41 = vadd.f32 %v527_v39, %v513_v38 }
 0x1c3   : > { %623 = vmatprep.subr.mxu0 %v545_v41  ;;  %752 = vmatprep.subr.mxu1 %v545_v41 }
 0x1c4   : > { %624 = vmatpush1.msra.mxu0 %v544_v40  ;;  %753 = vmatpush1.msra.mxu1 %v544_v40 }
 0x1c5   : > { %2244 = vmatmul.mubr.msk.f32.vlgmr.msra.gmra.mxu0 %vm580_vm0, %v552_v42  ;;  %2248 = vmatmul.mubr.msk.f32.vlgmr.msra.gmra.mxu1 %vm580_vm0, %v682_v43 }
 0x1c6   : > { %875 = vmatprep.subr.mxu0 %v551_v19  ;;  %663 = vmatprep.mubr.f32.mxu0 %v3771_v57 }
 0x1c7   : > { %876 = vmatpush1.msra.mxu0 %v550_v22  ;;  %792 = vmatprep.mubr.f32.mxu1 %v3771_v57 }
 0x1c8   : > { %877 = vmatprep.subr.mxu0 %v549_v31 }
 0x1c9   : > { %878 = vmatpush1.msra.mxu0 %v548_v30  ;;  %2249 = vmatmul.mubr.msk.f32.gmra.mxu1 %vm580_vm0, %v683_v44 }
 0x1ca   : > { %2245 = vmatmul.mubr.msk.f32.gmra.mxu0 %vm580_vm0, %v553_v45  ;;  %879 = vmatprep.subr.mxu0 %v547_v21 }
 0x1cb   : > { %880 = vmatpush1.msra.mxu0 %v546_v32  ;;  %669 = vmatprep.mubr.f32.mxu0 %v3771_v57 }
 0x1cc   : > { %881 = vmatprep.subr.mxu0 %v545_v41  ;;  %798 = vmatprep.mubr.f32.mxu1 %v3771_v57 }
 0x1cd   : > { %882 = vmatpush1.msra.mxu0 %v544_v40  ;;  %2250 = vmatmul.mubr.msk.f32.gmra.mxu1 %vm580_vm0, %v684_v46 }
 0x1ce   : > { %2246 = vmatmul.mubr.msk.f32.gmra.mxu0 %vm580_vm0, %v554_v47  ;;  %804 = vmatprep.mubr.f32.mxu1 %v3771_v57 }
 0x1cf   : > { %675 = vmatprep.mubr.f32.mxu0 %v3771_v57 }
 0x1d1   : > { %2251 = vmatmul.mubr.msk.f32.gmra.mxu1 %vm580_vm0, %v685_v48 }
 0x1d2   : > { %2247 = vmatmul.mubr.msk.f32.gmra.mxu0 %vm580_vm0, %v555_v49  ;;  %1164 = vmatprep.mubr.f32.mxu1 %v3771_v57 }
 0x1d3   : > { %915 = vmatprep.mubr.f32.mxu0 %v3771_v57 }
 0x285   : > { %v659_v51 = vpop.f32.mrf.mxu0  ;;  %v788_v52 = vpop.f32.mrf.mxu1 }
 0x286   : > { %v660_v54 = vadd.f32 %v659_v51, %v563_v50  ;;  %v789_v30 = vadd.f32 %v788_v52, %v693_v18 }
 0x287   : > { %v661_v55 = vpop.f32.mrf.mxu0  ;;  %v790_v56 = vpop.f32.mrf.mxu1 }
 0x288   : > { %v662_v58 = vadd.f32 %v661_v55, %v563_v50  ;;  %940 = vxpose.xlu1.b32.start [1/4] (short) %v660_v54, 128  ;;  %v791_v29 = vadd.f32 %v790_v56, %v693_v18 }
 0x289   : > { %v794_v59 = vpop.f32.mrf.mxu1 }
 0x28a   : > { %v665_v60 = vpop.f32.mrf.mxu0  ;;  %972 = vxpose.xlu0.b32.start [1/4] (short) %v662_v58, 128  ;;  %v795_v26 = vadd.f32 %v794_v59, %v698_v24 }
 0x28b   : > { %v666_v62 = vadd.f32 %v665_v60, %v568_v53  ;;  %v796_v63 = vpop.f32.mrf.mxu1 }
 0x28c   : > { %v667_v0 = vpop.f32.mrf.mxu0  ;;  %v797_v17 = vadd.f32 %v796_v63, %v698_v24 }
 0x28d   : > { %v668_v2 = vadd.f32 %v667_v0, %v568_v53  ;;  %941 = vxpose.xlu1.b32.cont [2/4] (short) %v666_v62, 128  ;;  %v800_v3 = vpop.f32.mrf.mxu1 }
 0x28e   : > { %v671_v4 = vpop.f32.mrf.mxu0  ;;  %v801_v25 = vadd.f32 %v800_v3, %v703_v12 }
 0x28f   : > { %v672_v5 = vadd.f32 %v671_v4, %v573_v61  ;;  %973 = vxpose.xlu0.b32.cont [2/4] (short) %v668_v2, 128  ;;  %v802_v6 = vpop.f32.mrf.mxu1 }
 0x290   : > { %v673_v7 = vpop.f32.mrf.mxu0  ;;  %v803_v23 = vadd.f32 %v802_v6, %v703_v12 }
 0x291   : > { %v674_v9 = vadd.f32 %v673_v7, %v573_v61  ;;  %942 = vxpose.xlu1.b32.cont [3/4] (short) %v672_v5, 128  ;;  %v806_v10 = vpop.f32.mrf.mxu1 }
 0x292   : > { %v677_v11 = vpop.f32.mrf.mxu0  ;;  %v807_v19 = vadd.f32 %v806_v10, %v708_v8 }
 0x293   : > { %v678_v13 = vadd.f32 %v677_v11, %v578_v1  ;;  %974 = vxpose.xlu0.b32.cont [3/4] (short) %v674_v9, 128  ;;  %v808_v14 = vpop.f32.mrf.mxu1 }
 0x294   : > { %v679_v15 = vpop.f32.mrf.mxu0  ;;  %v809_v16 = vadd.f32 %v808_v14, %v708_v8 }
 0x295   : > { %v680_v22 = vadd.f32 %v679_v15, %v578_v1  ;;  %943 = vxpose.xlu1.b32.end [4/4] (short) %v678_v13, 128 }
 0x296   : > { %1124 = vmatprep.subr.mxu1 %v809_v16 }
 0x297   : > { %975 = vxpose.xlu0.b32.end [4/4] (short) %v680_v22, 128  ;;  %1125 = vmatpush1.msra.mxu1 %v807_v19 }
 0x298   : > { %1126 = vmatprep.subr.mxu1 %v803_v23 }
 0x299   : > { %1127 = vmatpush1.msra.mxu1 %v801_v25 }
 0x29a   : > { %1128 = vmatprep.subr.mxu1 %v797_v17 }
 0x29b   : > { %1129 = vmatpush1.msra.mxu1 %v795_v26 }
 0x29c   : > { %1130 = vmatprep.subr.mxu1 %v791_v29 }
 0x29d   : > { %1131 = vmatpush1.msra.mxu1 %v789_v30 }
 0x305   : > { %v956_v31 = vpop.trf.xlu1 }
 0x306   : > { %2256 = vmatmul.mubr.msk.f32.vlgmr.msra.gmra.mxu1 %vm580_vm0, %v956_v31 }
 0x307   : > { %1170 = vmatprep.mubr.f32.mxu1 %v3771_v57  ;;  %v988_v36 = vpop.trf.xlu0 }
 0x309   : > { %v957_v20 = vpop.trf.xlu1 }
 0x30a   : > { %2257 = vmatmul.mubr.msk.f32.gmra.mxu1 %vm580_vm0, %v957_v20 }
 0x30b   : > { %1176 = vmatprep.mubr.f32.mxu1 %v3771_v57  ;;  %v989_v38 = vpop.trf.xlu0 }
 0x30d   : > { %v958_v32 = vpop.trf.xlu1 }
 0x30e   : > { %2258 = vmatmul.mubr.msk.f32.gmra.mxu1 %vm580_vm0, %v958_v32 }
 0x30f   : > { %1182 = vmatprep.mubr.f32.mxu1 %v3771_v57  ;;  %v990_v41 = vpop.trf.xlu0 }
 0x311   : > { %v959_v21 = vpop.trf.xlu1 }
 0x312   : > { %2259 = vmatmul.mubr.msk.f32.gmra.mxu1 %vm580_vm0, %v959_v21 }
 0x313   : > { %1188 = vmatprep.mubr.f32.mxu1 %v3771_v57  ;;  %v991_v43 = vpop.trf.xlu0 }
 0x315   : > { %v960_v27 = vpop.trf.xlu1 }
 0x316   : > { %2260 = vmatmul.mubr.msk.f32.gmra.mxu1 %vm580_vm0, %v960_v27 }
 0x317   : > { %1194 = vmatprep.mubr.f32.mxu1 %v3771_v57  ;;  %v992_v46 = vpop.trf.xlu0 }
 0x319   : > { %v961_v28 = vpop.trf.xlu1 }
 0x31a   : > { %2261 = vmatmul.mubr.msk.f32.gmra.mxu1 %vm580_vm0, %v961_v28 }
 0x31b   : > { %1200 = vmatprep.mubr.f32.mxu1 %v3771_v57  ;;  %v993_v48 = vpop.trf.xlu0 }
 0x31d   : > { %v962_v33 = vpop.trf.xlu1 }
 0x31e   : > { %2262 = vmatmul.mubr.msk.f32.gmra.mxu1 %vm580_vm0, %v962_v33 }
 0x31f   : > { %1206 = vmatprep.mubr.f32.mxu1 %v3771_v57  ;;  %v994_v49 = vpop.trf.xlu0 }
 0x321   : > { %v963_v34 = vpop.trf.xlu1 }
 0x322   : > { %2263 = vmatmul.mubr.msk.f32.gmra.mxu1 %vm580_vm0, %v963_v34 }
 0x323   : > { %1212 = vmatprep.mubr.f32.mxu1 %v3771_v57  ;;  %v995_v50 = vpop.trf.xlu0 }
 0x325   : > { %v964_v35 = vpop.trf.xlu1 }
 0x326   : > { %2264 = vmatmul.mubr.msk.f32.gmra.mxu1 %vm580_vm0, %v964_v35 }
 0x327   : > { %1218 = vmatprep.mubr.f32.mxu1 %v3771_v57  ;;  %v996_v51 = vpop.trf.xlu0 }
 0x329   : > { %v965_v37 = vpop.trf.xlu1 }
 0x32a   : > { %2265 = vmatmul.mubr.msk.f32.gmra.mxu1 %vm580_vm0, %v965_v37 }
 0x32b   : > { %1224 = vmatprep.mubr.f32.mxu1 %v3771_v57  ;;  %v997_v52 = vpop.trf.xlu0 }
 0x32d   : > { %v966_v39 = vpop.trf.xlu1 }
 0x32e   : > { %2266 = vmatmul.mubr.msk.f32.gmra.mxu1 %vm580_vm0, %v966_v39 }
 0x32f   : > { %1230 = vmatprep.mubr.f32.mxu1 %v3771_v57  ;;  %v998_v53 = vpop.trf.xlu0 }
 0x331   : > { %v967_v40 = vpop.trf.xlu1 }
 0x332   : > { %2267 = vmatmul.mubr.msk.f32.gmra.mxu1 %vm580_vm0, %v967_v40 }
 0x333   : > { %1236 = vmatprep.mubr.f32.mxu1 %v3771_v57  ;;  %v999_v54 = vpop.trf.xlu0 }
 0x335   : > { %v968_v42 = vpop.trf.xlu1 }
 0x336   : > { %2268 = vmatmul.mubr.msk.f32.gmra.mxu1 %vm580_vm0, %v968_v42 }
 0x337   : > { %1242 = vmatprep.mubr.f32.mxu1 %v3771_v57  ;;  %v1000_v55 = vpop.trf.xlu0 }
 0x339   : > { %v969_v44 = vpop.trf.xlu1 }
 0x33a   : > { %2269 = vmatmul.mubr.msk.f32.gmra.mxu1 %vm580_vm0, %v969_v44 }
 0x33b   : > { %1248 = vmatprep.mubr.f32.mxu1 %v3771_v57  ;;  %v1001_v56 = vpop.trf.xlu0 }
 0x33d   : > { %v970_v45 = vpop.trf.xlu1 }
 0x33e   : > { %2270 = vmatmul.mubr.msk.f32.gmra.mxu1 %vm580_vm0, %v970_v45 }
 0x33f   : > { %1254 = vmatprep.mubr.f32.mxu1 %v3771_v57  ;;  %v1002_v58 = vpop.trf.xlu0 }
 0x341   : > { %v971_v47 = vpop.trf.xlu1 }
 0x342   : > { %2271 = vmatmul.mubr.msk.f32.gmra.mxu1 %vm580_vm0, %v971_v47 }
 0x343   : > { %1260 = vmatprep.mubr.f32.mxu1 %v3771_v57  ;;  %v1003_v59 = vpop.trf.xlu0 }
 0x346   : > { %2272 = vmatmul.mubr.msk.f32.gmra.mxu1 %vm580_vm0, %v988_v36 }
 0x347   : > { %1266 = vmatprep.mubr.f32.mxu1 %v3771_v57 }
 0x34a   : > { %2273 = vmatmul.mubr.msk.f32.gmra.mxu1 %vm580_vm0, %v989_v38 }
 0x34b   : > { %1272 = vmatprep.mubr.f32.mxu1 %v3771_v57 }
 0x34e   : > { %2274 = vmatmul.mubr.msk.f32.gmra.mxu1 %vm580_vm0, %v990_v41 }
 0x34f   : > { %1278 = vmatprep.mubr.f32.mxu1 %v3771_v57 }
 0x352   : > { %2275 = vmatmul.mubr.msk.f32.gmra.mxu1 %vm580_vm0, %v991_v43 }
 0x353   : > { %1284 = vmatprep.mubr.f32.mxu1 %v3771_v57 }
 0x356   : > { %2276 = vmatmul.mubr.msk.f32.gmra.mxu1 %vm580_vm0, %v992_v46 }
 0x357   : > { %1290 = vmatprep.mubr.f32.mxu1 %v3771_v57 }
 0x35a   : > { %2277 = vmatmul.mubr.msk.f32.gmra.mxu1 %vm580_vm0, %v993_v48 }
 0x35b   : > { %1296 = vmatprep.mubr.f32.mxu1 %v3771_v57 }
 0x35e   : > { %2278 = vmatmul.mubr.msk.f32.gmra.mxu1 %vm580_vm0, %v994_v49 }
 0x35f   : > { %1302 = vmatprep.mubr.f32.mxu1 %v3771_v57 }
 0x362   : > { %2279 = vmatmul.mubr.msk.f32.gmra.mxu1 %vm580_vm0, %v995_v50 }
 0x363   : > { %1308 = vmatprep.mubr.f32.mxu1 %v3771_v57 }
 0x366   : > { %2280 = vmatmul.mubr.msk.f32.gmra.mxu1 %vm580_vm0, %v996_v51 }
 0x367   : > { %1314 = vmatprep.mubr.f32.mxu1 %v3771_v57 }
 0x36a   : > { %2281 = vmatmul.mubr.msk.f32.gmra.mxu1 %vm580_vm0, %v997_v52 }
 0x36b   : > { %1320 = vmatprep.mubr.f32.mxu1 %v3771_v57 }
 0x36e   : > { %2282 = vmatmul.mubr.msk.f32.gmra.mxu1 %vm580_vm0, %v998_v53 }
 0x36f   : > { %1326 = vmatprep.mubr.f32.mxu1 %v3771_v57 }
 0x372   : > { %2283 = vmatmul.mubr.msk.f32.gmra.mxu1 %vm580_vm0, %v999_v54 }
 0x373   : > { %1332 = vmatprep.mubr.f32.mxu1 %v3771_v57 }
 0x376   : > { %2284 = vmatmul.mubr.msk.f32.gmra.mxu1 %vm580_vm0, %v1000_v55 }
 0x377   : > { %1338 = vmatprep.mubr.f32.mxu1 %v3771_v57 }
 0x37a   : > { %2285 = vmatmul.mubr.msk.f32.gmra.mxu1 %vm580_vm0, %v1001_v56 }
 0x37b   : > { %1344 = vmatprep.mubr.f32.mxu1 %v3771_v57 }
 0x37e   : > { %2286 = vmatmul.mubr.msk.f32.gmra.mxu1 %vm580_vm0, %v1002_v58 }
 0x37f   : > { %1350 = vmatprep.mubr.f32.mxu1 %v3771_v57 }
 0x382   : > { %2287 = vmatmul.mubr.msk.f32.gmra.mxu1 %vm580_vm0, %v1003_v59 }
 0x383   : > { %2094 = vmatprep.mubr.f32.mxu1 %v3771_v57 }
 0x3c6   : > { %v3064_v60 = vpop.f32.mrf.mxu1 }
 0x3c8   : > { %v3066_v61 = vpop.f32.mrf.mxu1 }
 0x3ca   : > { %v3068_v62 = vpop.f32.mrf.mxu1 }
 0x3cc   : > { %v3070_v63 = vpop.f32.mrf.mxu1 }
 0x3ce   : > { %v3072_v0 = vpop.f32.mrf.mxu1 }
 0x3d0   : > { %v3074_v1 = vpop.f32.mrf.mxu1 }
 0x3d2   : > { %v3076_v2 = vpop.f32.mrf.mxu1 }
 0x3d4   : > { %v3078_v3 = vpop.f32.mrf.mxu1 }
 0x3d6   : > { %v3080_v4 = vpop.f32.mrf.mxu1 }
 0x3d8   : > { %v1192_v5 = vpop.f32.mrf.mxu1 }
 0x3da   : > { %v3082_v6 = vpop.f32.mrf.mxu1 }
 0x3dc   : > { %v3084_v7 = vpop.f32.mrf.mxu1 }
 0x3de   : > { %v1202_v8 = vpop.f32.mrf.mxu1 }
 0x3df   : > { %v3144_v58 = vmul.f32 0.17677669, %v1202_v8  ;;  %v3161_v8 = vmul.f32 0.17677669, %v3080_v4 }
 0x3e0   : > { %v1204_v9 = vpop.f32.mrf.mxu1 }
 0x3e1   : > { %v3134_v52 = vmul.f32 0.17677669, %v1204_v9  ;;  %3811 = vst [vmem:[#allocation13_spill] sm:$0xff] %v3144_v58  ;;  %v3150_v9 = vmul.f32 0.17677669, %v1192_v5  ;;  %3813 = vst [vmem:[#allocation15_spill] sm:$0xff] %v3161_v8 }
 0x3e2   : > { %v1208_v10 = vpop.f32.mrf.mxu1  ;;  %v3168_v5 = vmul.f32 0.17677669, %v3074_v1 }
 0x3e3   : > { %3810 = vst [vmem:[#allocation12_spill] sm:$0xff] %v3134_v52  ;;  %3812 = vst [vmem:[#allocation14_spill] sm:$0xff] %v3150_v9 }
 0x3e4   : > { %v1210_v11 = vpop.f32.mrf.mxu1  ;;  %3814 = vst [vmem:[#allocation16_spill] sm:$0xff] %v3168_v5 }
 0x3e6   : > { %v1214_v12 = vpop.f32.mrf.mxu1 }
 0x3e7   : > { %v3128_v49 = vmul.f32 0.17677669, %v1214_v12 }
 0x3e8   : > { %v1216_v13 = vpop.f32.mrf.mxu1 }
 0x3e9   : > { %v3118_v44 = vmul.f32 0.17677669, %v1216_v13  ;;  %v3152_v13 = vmul.f32 0.17677669, %v1210_v11  ;;  %v3171_v11 = vmul.f32 0.17677669, %v3084_v7 }
 0x3ea   : > { %v1220_v14 = vpop.f32.mrf.mxu1  ;;  %v3188_v7 = vmul.f32 0.17677669, %v3066_v61 }
 0x3eb   : > { %v1445_v54 = vmax.f32 %v3128_v49, %v3118_v44  ;;  %v3146_v59 = vmul.f32 0.17677669, %v1220_v14  ;;  %v3163_v14 = vmul.f32 0.17677669, %v1208_v10  ;;  %v3180_v10 = vmul.f32 0.17677669, %v3072_v0 }
 0x3ec   : > { %v1222_v15 = vpop.f32.mrf.mxu1  ;;  %3816 = vst [vmem:[#allocation18_spill] sm:$0xff] %v3188_v7 }
 0x3ed   : > { %v3136_v53 = vmul.f32 0.17677669, %v1222_v15  ;;  %v1439_v15 = vmax.f32 %v3144_v58, %v3134_v52  ;;  %3815 = vst [vmem:[#allocation17_spill] sm:$0xff] %v3180_v10 }
 0x3ee   : > { %v1226_v16 = vpop.f32.mrf.mxu1 }
 0x3ef   : > { %v3112_v41 = vmul.f32 0.17677669, %v1226_v16  ;;  %v1448_v16 = vmax.f32 %v3146_v59, %v3136_v53 }
 0x3f0   : > { %v1228_v19 = vpop.f32.mrf.mxu1 }
 0x3f1   : > { %v3102_v36 = vmul.f32 0.17677669, %v1228_v19 }
 0x3f2   : > { %v1232_v22 = vpop.f32.mrf.mxu1 }
 0x3f3   : > { %v1451_v46 = vmax.f32 %v3112_v41, %v3102_v36  ;;  %v3130_v50 = vmul.f32 0.17677669, %v1232_v22 }
 0x3f4   : > { %v1234_v23 = vpop.f32.mrf.mxu1 }
 0x3f5   : > { %v3120_v45 = vmul.f32 0.17677669, %v1234_v23  ;;  %v1433_v23 = vmax.f32 %v3161_v8, %v3150_v9 }
 0x3f6   : > { %v1238_v24 = vpop.f32.mrf.mxu1 }
 0x3f7   : > { %v3094_v28 = vmul.f32 0.17677669, %v1238_v24  ;;  %v1454_v55 = vmax.f32 %v3130_v50, %v3120_v45  ;;  %v1442_v24 = vmax.f32 %v3163_v14, %v3152_v13 }
 0x3f8   : > { %v1240_v25 = vpop.f32.mrf.mxu1 }
 0x3f9   : > { %v3090_v32 = vmul.f32 0.17677669, %v1240_v25  ;;  %v3183_v25 = vmul.f32 0.17677669, %v3082_v6  ;;  %v3200_v6 = vmul.f32 0.17677669, %v3064_v60 }
 0x3fa   : > { %v1244_v17 = vpop.f32.mrf.mxu1  ;;  %v3215_v60 = vmul.f32 0.17677669, %v3068_v62 }
 0x3fb   : > { %v1457_v38 = vmax.f32 %v3094_v28, %v3090_v32  ;;  %v3114_v42 = vmul.f32 0.17677669, %v1244_v17  ;;  %v3191_v17 = vmul.f32 0.17677669, %v3078_v3  ;;  %v1436_v0 = vmax.f32 %v3183_v25, %v3171_v11  ;;  %3817 = vst [vmem:[#allocation19_spill] sm:$0xff] %v3200_v6 }
 0x3fc   : > { %v1246_v18 = vpop.f32.mrf.mxu1  ;;  %v3208_v3 = vmul.f32 0.17677669, %v3070_v63 }
 0x3fd   : > { %v3104_v37 = vmul.f32 0.17677669, %v1246_v18  ;;  %v1427_v18 = vmax.f32 %v3180_v10, %v3168_v5 }
 0x3fe   : > { %v1250_v26 = vpop.f32.mrf.mxu1  ;;  %3818 = vst [vmem:[#allocation20_spill] sm:$0xff] %v3208_v3 }
 0x3ff   : > { %v3086_v30 = vmul.f32 0.17677669, %v1250_v26  ;;  %v1460_v47 = vmax.f32 %v3114_v42, %v3104_v37 }
 0x400   : > { %v1252_v29 = vpop.f32.mrf.mxu1 }
 0x401   : > { %v3088_v31 = vmul.f32 0.17677669, %v1252_v29  ;;  %v3203_v29 = vmul.f32 0.17677669, %v3076_v2 }
 0x402   : > { %v1256_v20 = vpop.f32.mrf.mxu1 }
 0x403   : > { %v1463_v21 = vmax.f32 %v3086_v30, %v3088_v31  ;;  %v3096_v33 = vmul.f32 0.17677669, %v1256_v20  ;;  %v1421_v20 = vmax.f32 %v3200_v6, %v3188_v7 }
 0x404   : > { %v1258_v27 = vpop.f32.mrf.mxu1 }
 0x405   : > { %v3098_v34 = vmul.f32 0.17677669, %v1258_v27  ;;  %1464 = vmax.xlane.f32.xlu1 %v1463_v21  ;;  %v1430_v21 = vmax.f32 %v3203_v29, %v3191_v17 }
 0x406   : > { %v3100_v35 = vpop.f32.mrf.mxu1 }
 0x407   : > { %v1466_v39 = vmax.f32 %v3096_v33, %v3098_v34 }
 0x408   : > { %v3110_v40 = vpop.f32.mrf.mxu1 }
 0x409   : > { %1458 = vmax.xlane.f32.xlu1 %v1457_v38  ;;  %1467 = vmax.xlane.f32.xlu0 %v1466_v39  ;;  %v1424_v38 = vmax.f32 %v3215_v60, %v3208_v3 }
 0x40a   : > { %v3116_v43 = vpop.f32.mrf.mxu1 }
 0x40c   : > { %v3126_v48 = vpop.f32.mrf.mxu1 }
 0x40d   : > { %1452 = vmax.xlane.f32.xlu1 %v1451_v46  ;;  %1461 = vmax.xlane.f32.xlu0 %v1460_v47 }
 0x40e   : > { %v3132_v51 = vpop.f32.mrf.mxu1 }
 0x410   : > { %v3142_v56 = vpop.f32.mrf.mxu1 }
 0x411   : > { %1446 = vmax.xlane.f32.xlu1 %v1445_v54  ;;  %1455 = vmax.xlane.f32.xlu0 %v1454_v55 }
 0x412   : > { %v3148_v12 = vpop.f32.mrf.mxu1 }
 0x414   : > { %v3158_v19 = vpop.f32.mrf.mxu1 }
 0x415   : > { %1440 = vmax.xlane.f32.xlu1 %v1439_v15  ;;  %1449 = vmax.xlane.f32.xlu0 %v1448_v16 }
 0x416   : > { %v3165_v22 = vpop.f32.mrf.mxu1 }
 0x418   : > { %v3177_v4 = vpop.f32.mrf.mxu1 }
 0x419   : > { %1434 = vmax.xlane.f32.xlu1 %v1433_v23  ;;  %1443 = vmax.xlane.f32.xlu0 %v1442_v24 }
 0x41a   : > { %v3185_v1 = vpop.f32.mrf.mxu1 }
 0x41c   : > { %v3197_v26 = vpop.f32.mrf.mxu1 }
 0x41d   : > { %1428 = vmax.xlane.f32.xlu1 %v1427_v18  ;;  %1437 = vmax.xlane.f32.xlu0 %v1436_v0 }
 0x41e   : > { %v3205_v61 = vpop.f32.mrf.mxu1 }
 0x420   : > { %v1300_v27 = vpop.f32.mrf.mxu1 }
 0x421   : > { %1422 = vmax.xlane.f32.xlu1 %v1421_v20  ;;  %1431 = vmax.xlane.f32.xlu0 %v1430_v21 }
 0x422   : > { %v1304_v2 = vpop.f32.mrf.mxu1 }
 0x424   : > { %v1306_v39 = vpop.f32.mrf.mxu1 }
 0x425   : > { %1425 = vmax.xlane.f32.xlu0 %v1424_v38 }
 0x426   : > { %v1310_v63 = vpop.f32.mrf.mxu1 }
 0x428   : > { %v1312_v46 = vpop.f32.mrf.mxu1 }
 0x42a   : > { %v1316_v47 = vpop.f32.mrf.mxu1 }
 0x42c   : > { %v1318_v54 = vpop.f32.mrf.mxu1 }
 0x42e   : > { %v1322_v55 = vpop.f32.mrf.mxu1 }
 0x42f   : > { %v3241_v3 = vmul.f32 0.17677669, %v1322_v55 }
 0x430   : > { %v1324_v15 = vpop.f32.mrf.mxu1 }
 0x431   : > { %v3233_v58 = vmul.f32 0.17677669, %v1324_v15 }
 0x432   : > { %v1328_v16 = vpop.f32.mrf.mxu1 }
 0x433   : > { %v3251_v15 = vmul.f32 0.17677669, %v1328_v16  ;;  %v3265_v16 = vmul.f32 0.17677669, %v1306_v39  ;;  %v3820_v39 = vmov 0.0  }
 0x434   : > { %v1330_v23 = vpop.f32.mrf.mxu1 }
 0x436   : > { %v1334_v24 = vpop.f32.mrf.mxu1 }
 0x437   : > { %v3227_v9 = vmul.f32 0.17677669, %v1334_v24  ;;  %v3253_v24 = vmul.f32 0.17677669, %v1318_v54 }
 0x438   : > { %v1336_v18 = vpop.f32.mrf.mxu1 }
 0x439   : > { %v3223_v38 = vmul.f32 0.17677669, %v1336_v18 }
 0x43a   : > { %v1340_v62 = vpop.f32.mrf.mxu1 }
 0x43c   : > { %v1342_v0 = vpop.f32.mrf.mxu1 }
 0x43e   : > { %v1346_v20 = vpop.f32.mrf.mxu1 }
 0x43f   : > { %v3219_v57 = vmul.f32 0.17677669, %v1346_v20  ;;  %v3235_v20 = vmul.f32 0.17677669, %v1342_v0 }
 0x440   : > { %v1348_v21 = vpop.f32.mrf.mxu1 }
 0x441   : > { %v3221_v7 = vmul.f32 0.17677669, %v1348_v21  ;;  %v1505_v21 = vmax.f32 %v3227_v9, %v3223_v38 }
 0x442   : > { %v1352_v6 = vpop.f32.mrf.mxu1 }
 0x443   : > { %3819 = vst [vmem:[#allocation21_spill] sm:$0xff] %v3221_v7  ;;  %v1511_v5 = vmax.f32 %v3219_v57, %v3221_v7  ;;  %v3229_v8 = vmul.f32 0.17677669, %v1352_v6  ;;  %v3243_v7 = vmul.f32 0.17677669, %v1340_v62 }
 0x444   : > { %v1354_v10 = vpop.f32.mrf.mxu1  ;;  %v3245_v6 = vmul.f32 0.17677669, %v1330_v23  ;;  %v3257_v62 = vmul.f32 0.17677669, %v1316_v47  ;;  %v3259_v23 = vmul.f32 0.17677669, %v1312_v46 }
 0x445   : > { %v3231_v52 = vmul.f32 0.17677669, %v1354_v10  ;;  %1512 = vmax.xlane.f32.xlu1 %v1511_v5  ;;  %v1499_v5 = vmax.f32 %v3241_v3, %v3233_v58  ;;  %v1508_v10 = vmax.f32 %v3243_v7, %v3235_v20  ;;  %v811_v47 = vld [vmem:[#allocation2] sm:$0xff] }
 0x446   : > { %v1502_v55 = vmax.f32 %v3251_v15, %v3245_v6  ;;  %v1496_v0 = vmax.f32 %v3257_v62, %v3253_v24  ;;  %2252 = vmatmul.mubr.msk.f32.vlgmr.msra.gmra.mxu0 %vm580_vm0, %v811_v47  ;;  %v3306_v47 = vmul.f32 0.17677669, %v3148_v12 }
 0x447   : > { %v1514_v18 = vmax.f32 %v3229_v8, %v3231_v52  ;;  %921 = vmatprep.mubr.f32.mxu0 %v3820_v39 }
 0x449   : > { %1506 = vmax.xlane.f32.xlu1 %v1505_v21  ;;  %1515 = vmax.xlane.f32.xlu0 %v1514_v18  ;;  %v3263_v21 = vmul.f32 0.17677669, %v1310_v63  ;;  %v3269_v18 = vmul.f32 0.17677669, %v1304_v2  ;;  %v3281_v63 = vmul.f32 0.17677669, %v3197_v26 }
 0x44a   : > { %v813_v26 = vld [vmem:[#allocation2 + $0x10] sm:$0xff] }
 0x44b   : > { %v1493_v54 = vmax.f32 %v3263_v21, %v3259_v23  ;;  %v1490_v46 = vmax.f32 %v3269_v18, %v3265_v16 }
 0x44d   : > { %1500 = vmax.xlane.f32.xlu1 %v1499_v5  ;;  %1509 = vmax.xlane.f32.xlu0 %v1508_v10  ;;  %v3271_v5 = vmul.f32 0.17677669, %v1300_v27  ;;  %v3276_v10 = vmul.f32 0.17677669, %v3205_v61  ;;  %v812_v27 = vld [vmem:[#allocation2 + $0x8] sm:$0xff] }
 0x44e   : > { %2253 = vmatmul.mubr.msk.f32.gmra.mxu0 %vm580_vm0, %v812_v27  ;;  %v3291_v61 = vmul.f32 0.17677669, %v3177_v4  ;;  %v814_v4 = vld [vmem:[#allocation2 + $0x18] sm:$0xff]  ;;  %v3315_v27 = vmul.f32 0.17677669, %v3132_v51 }
 0x44f   : > { %v1487_v2 = vmax.f32 %v3276_v10, %v3271_v5  ;;  %927 = vmatprep.mubr.f32.mxu0 %v3820_v39  ;;  %v3331_v51 = vmul.f32 0.17677669, %v3100_v35 }
 0x451   : > { %1503 = vmax.xlane.f32.xlu0 %v1502_v55  ;;  %v3286_v55 = vmul.f32 0.17677669, %v3185_v1  ;;  %v3301_v1 = vmul.f32 0.17677669, %v3158_v19  ;;  %v3318_v19 = vmul.f32 0.17677669, %v3126_v48 }
 0x452   : > { %2254 = vmatmul.mubr.msk.f32.gmra.mxu0 %vm580_vm0, %v813_v26 }
 0x453   : > { %933 = vmatprep.mubr.f32.mxu0 %v3820_v39  ;;  %3822 = vst [vmem:[#allocation23_spill] sm:$0xff] %v3318_v19 }
 0x455   : > { %1497 = vmax.xlane.f32.xlu0 %v1496_v0  ;;  %v1484_v0 = vmax.f32 %v3286_v55, %v3281_v63 }
 0x456   : > { %2255 = vmatmul.mubr.msk.f32.gmra.mxu0 %vm580_vm0, %v814_v4 }
 0x459   : > { %1494 = vmax.xlane.f32.xlu0 %v1493_v54  ;;  %v3296_v54 = vmul.f32 0.17677669, %v3165_v22  ;;  %v3310_v22 = vmul.f32 0.17677669, %v3142_v56  ;;  %v3326_v56 = vmul.f32 0.17677669, %v3110_v40 }
 0x45b   : > { %3821 = vst [vmem:[#allocation22_spill] sm:$0xff] %v3310_v22  ;;  %v1475_v12 = vmax.f32 %v3315_v27, %v3310_v22  ;;  %3824 = vst [vmem:[#allocation25_spill] sm:$0xff] %v3326_v56  ;;  %v1469_v48 = vmax.f32 %v3331_v51, %v3326_v56 }
 0x45d   : > { %1491 = vmax.xlane.f32.xlu0 %v1490_v46  ;;  %v1481_v46 = vmax.f32 %v3296_v54, %v3291_v61 }
 0x461   : > { %1488 = vmax.xlane.f32.xlu0 %v1487_v2  ;;  %v1478_v2 = vmax.f32 %v3306_v47, %v3301_v1 }
 0x465   : > { %1485 = vmax.xlane.f32.xlu0 %v1484_v0  ;;  %v3323_v0 = vmul.f32 0.17677669, %v3116_v43 }
 0x467   : > { %3823 = vst [vmem:[#allocation24_spill] sm:$0xff] %v3323_v0  ;;  %v1472_v26 = vmax.f32 %v3323_v0, %v3318_v19 }
 0x469   : > { %1482 = vmax.xlane.f32.xlu0 %v1481_v46 }
 0x46d   : > { %1479 = vmax.xlane.f32.xlu0 %v1478_v2 }
 0x471   : > { %1476 = vmax.xlane.f32.xlu0 %v1475_v12 }
 0x475   : > { %1473 = vmax.xlane.f32.xlu0 %v1472_v26 }
 0x479   : > { %1470 = vmax.xlane.f32.xlu0 %v1469_v48 }
 0x48e   : > { %v1465_v46 = vpop.xlane.xlu1 %1464 }
 0x48f   : > { %v1545_v4 = vsub.f32 %v3086_v30, %v1465_v46  ;;  %v1546_v43 = vsub.f32 %v3088_v31, %v1465_v46 }
 0x491   : > { %v1637_v39 = vmul.f32 1.442695, %v1545_v4  ;;  %v1639_v35 = vmul.f32 1.442695, %v1546_v43 }
 0x492   : > { %v1468_v2 = vpop.xlane.xlu0 %1467  ;;  %v1459_v22 = vpop.xlane.xlu1 %1458 }
 0x493   : > { %v1547_v40 = vsub.f32 %v3096_v33, %v1468_v2  ;;  %v1548_v12 = vsub.f32 %v3098_v34, %v1468_v2  ;;  %v1541_v30 = vsub.f32 %v3094_v28, %v1459_v22  ;;  %v1542_v33 = vsub.f32 %v3090_v32, %v1459_v22 }
 0x495   : > { %v1641_v19 = vmul.f32 1.442695, %v1547_v40  ;;  %v1643_v0 = vmul.f32 1.442695, %v1548_v12  ;;  %v1629_v2 = vmul.f32 1.442695, %v1541_v30 }
 0x496   : > { %v1462_v26 = vpop.xlane.xlu0 %1461  ;;  %v1453_v4 = vpop.xlane.xlu1 %1452 }
 0x497   : > { %2375 = vpow2.f32 %v1641_v19  ;;  %v1543_v56 = vsub.f32 %v3114_v42, %v1462_v26  ;;  %v1544_v48 = vsub.f32 %v3104_v37, %v1462_v26  ;;  %v1631_v19 = vmul.f32 1.442695, %v1542_v33 }
 0x498   : > { %2377 = vpow2.f32 %v1643_v0  ;;  %v1538_v0 = vsub.f32 %v3102_v36, %v1453_v4 }
 0x499   : > { %2379 = vpow2.f32 %v1637_v39  ;;  %v1633_v31 = vmul.f32 1.442695, %v1543_v56  ;;  %v1635_v34 = vmul.f32 1.442695, %v1544_v48  ;;  %v1537_v39 = vsub.f32 %v3112_v41, %v1453_v4 }
 0x49a   : > { %2381 = vpow2.f32 %v1639_v35  ;;  %v1456_v46 = vpop.xlane.xlu0 %1455  ;;  %v1447_v22 = vpop.xlane.xlu1 %1446  ;;  %v1623_v26 = vmul.f32 1.442695, %v1538_v0 }
 0x49b   : > { %2383 = vpow2.f32 %v1633_v31  ;;  %v1539_v43 = vsub.f32 %v3130_v50, %v1456_v46  ;;  %v1540_v42 = vsub.f32 %v3120_v45, %v1456_v46  ;;  %v1621_v50 = vmul.f32 1.442695, %v1537_v39 }
 0x49c   : > { %2385 = vpow2.f32 %v1635_v34  ;;  %v1533_v34 = vsub.f32 %v3128_v49, %v1447_v22 }
 0x49d   : > { %2387 = vpow2.f32 %v1629_v2  ;;  %v1625_v28 = vmul.f32 1.442695, %v1539_v43  ;;  %v1627_v32 = vmul.f32 1.442695, %v1540_v42 }
 0x49e   : > { %v1450_v37 = vpop.xlane.xlu0 %1449  ;;  %2389 = vpow2.f32 %v1631_v19  ;;  %v1441_v46 = vpop.xlane.xlu1 %1440  ;;  %v1613_v39 = vmul.f32 1.442695, %v1533_v34 }
 0x49f   : > { %2391 = vpow2.f32 %v1625_v28  ;;  %v1535_v35 = vsub.f32 %v3146_v59, %v1450_v37  ;;  %v1536_v41 = vsub.f32 %v3136_v53, %v1450_v37  ;;  %v1534_v53 = vsub.f32 %v3118_v44, %v1447_v22 }
 0x4a0   : > { %2393 = vpow2.f32 %v1627_v32 }
 0x4a1   : > { %2395 = vpow2.f32 %v1621_v50  ;;  %v1617_v59 = vmul.f32 1.442695, %v1535_v35  ;;  %v1619_v19 = vmul.f32 1.442695, %v1536_v41  ;;  %v1615_v22 = vmul.f32 1.442695, %v1534_v53 }
 0x4a2   : > { %v1444_v56 = vpop.xlane.xlu0 %1443  ;;  %2397 = vpow2.f32 %v1623_v26  ;;  %v1435_v35 = vpop.xlane.xlu1 %1434 }
 0x4a3   : > { %v1531_v28 = vsub.f32 %v3163_v14, %v1444_v56  ;;  %v1532_v50 = vsub.f32 %v3152_v13, %v1444_v56 }
 0x4a4   : > { %v3347_v40 = vpop.eup %2375 }
 0x4a5   : > { %v3349_v12 = vpop.eup %2377 }
 0x4a6   : > { %v3352_v45 = vpop.eup %2379  ;;  %v1438_v48 = vpop.xlane.xlu0 %1437  ;;  %v1754_v36 = vadd.f32 %v3349_v12, %v3347_v40 }
 0x4a7   : > { %v3357_v30 = vpop.eup %2381  ;;  %v1527_v31 = vsub.f32 %v3183_v25, %v1438_v48  ;;  %v1528_v33 = vsub.f32 %v3171_v11, %v1438_v48  ;;  %v3825_v48 = vld [vmem:[#allocation20_spill] sm:$0xff] }
 0x4a8   : > { %1755 = vadd.xlane.f32.xlu1 %v1754_v36  ;;  %v3362_v43 = vpop.eup %2383  ;;  %v1751_v25 = vadd.f32 %v3357_v30, %v3352_v45  ;;  %v3826_v36 = vld [vmem:[#allocation13_spill] sm:$0xff] }
 0x4a9   : > { %v1601_v4 = vmul.f32 1.442695, %v1527_v31  ;;  %v1603_v2 = vmul.f32 1.442695, %v1528_v33  ;;  %v3367_v37 = vpop.eup %2385  ;;  %v1529_v31 = vsub.f32 %v3826_v36, %v1441_v46  ;;  %v1609_v33 = vmul.f32 1.442695, %v1531_v28 }
 0x4aa   : > { %v1432_v42 = vpop.xlane.xlu0 %1431  ;;  %v3372_v32 = vpop.eup %2387 }
 0x4ab   : > { %2399 = vpow2.f32 %v1601_v4  ;;  %v1523_v49 = vsub.f32 %v3203_v29, %v1432_v42  ;;  %v1524_v11 = vsub.f32 %v3191_v17, %v1432_v42  ;;  %v1748_v29 = vadd.f32 %v3367_v37, %v3362_v43  ;;  %v3377_v17 = vpop.eup %2389 }
 0x4ac   : > { %2401 = vpow2.f32 %v1603_v2  ;;  %1752 = vadd.xlane.f32.xlu1 %v1751_v25  ;;  %v3382_v56 = vpop.eup %2391  ;;  %v1611_v2 = vmul.f32 1.442695, %v1532_v50  ;;  %v1745_v53 = vadd.f32 %v3377_v17, %v3372_v32  ;;  %v1429_v25 = vpop.xlane.xlu1 %1428 }
 0x4ad   : > { %2403 = vpow2.f32 %v1617_v59  ;;  %v1593_v0 = vmul.f32 1.442695, %v1523_v49  ;;  %v1595_v44 = vmul.f32 1.442695, %v1524_v11  ;;  %v3827_v59 = vld [vmem:[#allocation12_spill] sm:$0xff]  ;;  %v3829_v11 = vld [vmem:[#allocation14_spill] sm:$0xff] }
 0x4ae   : > { %2405 = vpow2.f32 %v1619_v19  ;;  %v1426_v26 = vpop.xlane.xlu0 %1425  ;;  %v1530_v4 = vsub.f32 %v3827_v59, %v1441_v46  ;;  %v3828_v19 = vld [vmem:[#allocation15_spill] sm:$0xff]  ;;  %v1605_v49 = vmul.f32 1.442695, %v1529_v31 }
 0x4af   : > { %2407 = vpow2.f32 %v1593_v0  ;;  %v1519_v41 = vsub.f32 %v3215_v60, %v1426_v26  ;;  %v1520_v14 = vsub.f32 %v3825_v48, %v1426_v26  ;;  %v3387_v60 = vpop.eup %2393  ;;  %v1525_v42 = vsub.f32 %v3828_v19, %v1435_v35 }
 0x4b0   : > { %2409 = vpow2.f32 %v1595_v44  ;;  %1749 = vadd.xlane.f32.xlu1 %v1748_v29  ;;  %v3391_v28 = vpop.eup %2395  ;;  %v1607_v0 = vmul.f32 1.442695, %v1530_v4  ;;  %v1742_v46 = vadd.f32 %v3387_v60, %v3382_v56  ;;  %v1423_v31 = vpop.xlane.xlu1 %1422 }
 0x4b1   : > { %2411 = vpow2.f32 %v1613_v39  ;;  %v1585_v34 = vmul.f32 1.442695, %v1519_v41  ;;  %v1587_v13 = vmul.f32 1.442695, %v1520_v14  ;;  %v1526_v39 = vsub.f32 %v3829_v11, %v1435_v35  ;;  %v3395_v44 = vpop.eup %2397  ;;  %v3832_v41 = vld [vmem:[#allocation17_spill] sm:$0xff]  ;;  %v3833_v14 = vld [vmem:[#allocation16_spill] sm:$0xff] }
 0x4b2   : > { %2413 = vpow2.f32 %v1615_v22  ;;  %v1597_v50 = vmul.f32 1.442695, %v1525_v42  ;;  %v1521_v48 = vsub.f32 %v3832_v41, %v1429_v25  ;;  %v1522_v36 = vsub.f32 %v3833_v14, %v1429_v25 }
 0x4b3   : > { %2415 = vpow2.f32 %v1585_v34  ;;  %v1599_v29 = vmul.f32 1.442695, %v1526_v39  ;;  %v1739_v34 = vadd.f32 %v3395_v44, %v3391_v28 }
 0x4b4   : > { %2417 = vpow2.f32 %v1587_v13  ;;  %1746 = vadd.xlane.f32.xlu1 %v1745_v53  ;;  %v3836_v53 = vld [vmem:[#allocation19_spill] sm:$0xff]  ;;  %v1591_v25 = vmul.f32 1.442695, %v1522_v36 }
 0x4b5   : > { %2419 = vpow2.f32 %v1609_v33  ;;  %v1517_v19 = vsub.f32 %v3836_v53, %v1423_v31 }
 0x4b6   : > { %2421 = vpow2.f32 %v1611_v2  ;;  %v1589_v2 = vmul.f32 1.442695, %v1521_v48 }
 0x4b7   : > { %2423 = vpow2.f32 %v1605_v49  ;;  %v3837_v49 = vld [vmem:[#allocation18_spill] sm:$0xff]  ;;  %v1581_v41 = vmul.f32 1.442695, %v1517_v19 }
 0x4b8   : > { %v3397_v22 = vpop.eup %2399  ;;  %1743 = vadd.xlane.f32.xlu1 %v1742_v46  ;;  %2425 = vpow2.f32 %v1607_v0  ;;  %v1518_v11 = vsub.f32 %v3837_v49, %v1423_v31 }
 0x4b9   : > { %3830 = vst [vmem:[#allocation20_spill] sm:$0xff] %v3397_v22  ;;  %v3399_v26 = vpop.eup %2401  ;;  %2427 = vpow2.f32 %v1597_v50 }
 0x4ba   : > { %3831 = vst [vmem:[#allocation13_spill] sm:$0xff] %v3399_v26  ;;  %v3402_v35 = vpop.eup %2403  ;;  %v1724_v33 = vadd.f32 %v3399_v26, %v3397_v22  ;;  %2429 = vpow2.f32 %v1599_v29  ;;  %v1583_v14 = vmul.f32 1.442695, %v1518_v11 }
 0x4bb   : > { %v3409_v13 = vpop.eup %2405  ;;  %2431 = vpow2.f32 %v1589_v2 }
 0x4bc   : > { %v3411_v59 = vpop.eup %2407  ;;  %1725 = vadd.xlane.f32.xlu0 %v1724_v33  ;;  %1740 = vadd.xlane.f32.xlu1 %v1739_v34  ;;  %v1736_v0 = vadd.f32 %v3409_v13, %v3402_v35  ;;  %2433 = vpow2.f32 %v1591_v25 }
 0x4bd   : > { %3834 = vst [vmem:[#allocation12_spill] sm:$0xff] %v3411_v59  ;;  %v3413_v4 = vpop.eup %2409  ;;  %2435 = vpow2.f32 %v1581_v41 }
 0x4be   : > { %3835 = vst [vmem:[#allocation15_spill] sm:$0xff] %v3413_v4  ;;  %v3416_v42 = vpop.eup %2411  ;;  %v1718_v39 = vadd.f32 %v3413_v4, %v3411_v59  ;;  %2437 = vpow2.f32 %v1583_v14 }
 0x4bf   : > { %v3423_v46 = vpop.eup %2413 }
 0x4c0   : > { %v3425_v50 = vpop.eup %2415  ;;  %1719 = vadd.xlane.f32.xlu0 %v1718_v39  ;;  %1737 = vadd.xlane.f32.xlu1 %v1736_v0  ;;  %v1733_v31 = vadd.f32 %v3423_v46, %v3416_v42 }
 0x4c1   : > { %3838 = vst [vmem:[#allocation14_spill] sm:$0xff] %v3425_v50  ;;  %v3427_v29 = vpop.eup %2417 }
 0x4c2   : > { %3839 = vst [vmem:[#allocation17_spill] sm:$0xff] %v3427_v29  ;;  %v3429_v48 = vpop.eup %2419  ;;  %v1712_v36 = vadd.f32 %v3427_v29, %v3425_v50 }
 0x4c3   : > { %v3435_v33 = vpop.eup %2421 }
 0x4c4   : > { %1713 = vadd.xlane.f32.xlu0 %v1712_v36  ;;  %1734 = vadd.xlane.f32.xlu1 %v1733_v31  ;;  %v3437_v34 = vpop.eup %2423  ;;  %v1730_v2 = vadd.f32 %v3435_v33, %v3429_v48  ;;  %v3844_v36 = vld [vmem:[#allocation21_spill] sm:$0xff] }
 0x4c5   : > { %3840 = vst [vmem:[#allocation16_spill] sm:$0xff] %v3437_v34  ;;  %v3441_v53 = vpop.eup %2425 }
 0x4c6   : > { %v3443_v19 = vpop.eup %2427  ;;  %v1727_v49 = vadd.f32 %v3441_v53, %v3437_v34 }
 0x4c7   : > { %3841 = vst [vmem:[#allocation19_spill] sm:$0xff] %v3443_v19  ;;  %v3445_v25 = vpop.eup %2429 }
 0x4c8   : > { %1731 = vadd.xlane.f32.xlu1 %v1730_v2  ;;  %3842 = vst [vmem:[#allocation18_spill] sm:$0xff] %v3445_v25  ;;  %v3449_v11 = vpop.eup %2431  ;;  %v1721_v0 = vadd.f32 %v3445_v25, %v3443_v19 }
 0x4c9   : > { %3843 = vst [vmem:[#allocation26_spill] sm:$0xff] %v3449_v11  ;;  %v3453_v41 = vpop.eup %2433 }
 0x4ca   : > { %v3457_v29 = vpop.eup %2435 }
 0x4cb   : > { %v3461_v22 = vpop.eup %2437 }
 0x4cc   : > { %1728 = vadd.xlane.f32.xlu1 %v1727_v49  ;;  %v1715_v49 = vadd.f32 %v3453_v41, %v3449_v11  ;;  %v1709_v11 = vadd.f32 %v3461_v22, %v3457_v29 }
 0x4ce   : > { %v1513_v39 = vpop.xlane.xlu1 %1512 }
 0x4cf   : > { %v1577_v14 = vsub.f32 %v3219_v57, %v1513_v39  ;;  %v1578_v31 = vsub.f32 %v3844_v36, %v1513_v39 }
 0x4d0   : > { %1722 = vadd.xlane.f32.xlu1 %v1721_v0 }
 0x4d1   : > { %v1701_v2 = vmul.f32 1.442695, %v1577_v14  ;;  %v1703_v50 = vmul.f32 1.442695, %v1578_v31 }
 0x4d2   : > { %v1516_v59 = vpop.xlane.xlu0 %1515  ;;  %v1507_v4 = vpop.xlane.xlu1 %1506 }
 0x4d3   : > { %2439 = vpow2.f32 %v1701_v2  ;;  %v1579_v19 = vsub.f32 %v3229_v8, %v1516_v59  ;;  %v1580_v25 = vsub.f32 %v3231_v52, %v1516_v59  ;;  %v1573_v57 = vsub.f32 %v3227_v9, %v1507_v4 }
 0x4d4   : > { %2441 = vpow2.f32 %v1703_v50  ;;  %v1574_v39 = vsub.f32 %v3223_v38, %v1507_v4  ;;  %1716 = vadd.xlane.f32.xlu1 %v1715_v49 }
 0x4d5   : > { %v1705_v0 = vmul.f32 1.442695, %v1579_v19  ;;  %v1707_v14 = vmul.f32 1.442695, %v1580_v25  ;;  %v1693_v36 = vmul.f32 1.442695, %v1573_v57 }
 0x4d6   : > { %v1695_v31 = vmul.f32 1.442695, %v1574_v39  ;;  %v1510_v26 = vpop.xlane.xlu0 %1509  ;;  %v1501_v34 = vpop.xlane.xlu1 %1500 }
 0x4d7   : > { %2443 = vpow2.f32 %v1705_v0  ;;  %v1575_v8 = vsub.f32 %v3243_v7, %v1510_v26  ;;  %v1576_v52 = vsub.f32 %v3235_v20, %v1510_v26  ;;  %v1569_v9 = vsub.f32 %v3241_v3, %v1501_v34 }
 0x4d8   : > { %2445 = vpow2.f32 %v1707_v14  ;;  %v1570_v38 = vsub.f32 %v3233_v58, %v1501_v34  ;;  %1710 = vadd.xlane.f32.xlu1 %v1709_v11 }
 0x4d9   : > { %2447 = vpow2.f32 %v1693_v36  ;;  %v1697_v59 = vmul.f32 1.442695, %v1575_v8  ;;  %v1699_v4 = vmul.f32 1.442695, %v1576_v52  ;;  %v1685_v50 = vmul.f32 1.442695, %v1569_v9 }
 0x4da   : > { %2449 = vpow2.f32 %v1695_v31  ;;  %v1687_v19 = vmul.f32 1.442695, %v1570_v38  ;;  %v1504_v25 = vpop.xlane.xlu0 %1503 }
 0x4db   : > { %2451 = vpow2.f32 %v1697_v59  ;;  %v1571_v2 = vsub.f32 %v3251_v15, %v1504_v25  ;;  %v1572_v7 = vsub.f32 %v3245_v6, %v1504_v25 }
 0x4dc   : > { %2453 = vpow2.f32 %v1699_v4 }
 0x4dd   : > { %2455 = vpow2.f32 %v1685_v50  ;;  %v1689_v20 = vmul.f32 1.442695, %v1571_v2  ;;  %v1691_v3 = vmul.f32 1.442695, %v1572_v7 }
 0x4de   : > { %2457 = vpow2.f32 %v1687_v19  ;;  %v1498_v26 = vpop.xlane.xlu0 %1497 }
 0x4df   : > { %2459 = vpow2.f32 %v1689_v20  ;;  %v1567_v58 = vsub.f32 %v3257_v62, %v1498_v26  ;;  %v1568_v34 = vsub.f32 %v3253_v24, %v1498_v26 }
 0x4e0   : > { %v3477_v11 = vpop.eup %2439  ;;  %2461 = vpow2.f32 %v1691_v3 }
 0x4e1   : > { %v3479_v49 = vpop.eup %2441  ;;  %v1681_v57 = vmul.f32 1.442695, %v1567_v58  ;;  %v1683_v15 = vmul.f32 1.442695, %v1568_v34 }
 0x4e2   : > { %v1495_v39 = vpop.xlane.xlu0 %1494  ;;  %v1799_v6 = vadd.f32 %v3479_v49, %v3477_v11 }
 0x4e3   : > { %2463 = vpow2.f32 %v1681_v57  ;;  %v1565_v0 = vsub.f32 %v3263_v21, %v1495_v39  ;;  %v1566_v14 = vsub.f32 %v3259_v23, %v1495_v39 }
 0x4e4   : > { %v3485_v36 = vpop.eup %2443  ;;  %2465 = vpow2.f32 %v1683_v15  ;;  %1800 = vadd.xlane.f32.xlu1 %v1799_v6 }
 0x4e5   : > { %v3487_v24 = vpop.eup %2445  ;;  %v1677_v62 = vmul.f32 1.442695, %v1565_v0  ;;  %v1679_v31 = vmul.f32 1.442695, %v1566_v14 }
 0x4e6   : > { %v3489_v8 = vpop.eup %2447  ;;  %v1492_v52 = vpop.xlane.xlu0 %1491  ;;  %v1802_v9 = vadd.f32 %v3487_v24, %v3485_v36 }
 0x4e7   : > { %v3493_v38 = vpop.eup %2449  ;;  %2467 = vpow2.f32 %v1677_v62  ;;  %v1563_v21 = vsub.f32 %v3269_v18, %v1492_v52  ;;  %v1564_v23 = vsub.f32 %v3265_v16, %v1492_v52 }
 0x4e8   : > { %v3497_v59 = vpop.eup %2451  ;;  %2469 = vpow2.f32 %v1679_v31  ;;  %1803 = vadd.xlane.f32.xlu0 %v1802_v9  ;;  %v1793_v4 = vadd.f32 %v3493_v38, %v3489_v8 }
 0x4e9   : > { %v3501_v50 = vpop.eup %2453  ;;  %v1673_v19 = vmul.f32 1.442695, %v1563_v21  ;;  %v1675_v25 = vmul.f32 1.442695, %v1564_v23 }
 0x4ea   : > { %v3503_v2 = vpop.eup %2455  ;;  %1794 = vadd.xlane.f32.xlu1 %v1793_v4  ;;  %v1489_v7 = vpop.xlane.xlu0 %1488  ;;  %v1796_v18 = vadd.f32 %v3501_v50, %v3497_v59 }
 0x4eb   : > { %v3507_v20 = vpop.eup %2457  ;;  %2471 = vpow2.f32 %v1673_v19  ;;  %v1561_v16 = vsub.f32 %v3276_v10, %v1489_v7  ;;  %v1562_v3 = vsub.f32 %v3271_v5, %v1489_v7 }
 0x4ec   : > { %v3511_v26 = vpop.eup %2459  ;;  %2473 = vpow2.f32 %v1675_v25  ;;  %1797 = vadd.xlane.f32.xlu0 %v1796_v18  ;;  %v1787_v58 = vadd.f32 %v3507_v20, %v3503_v2 }
 0x4ed   : > { %v3515_v34 = vpop.eup %2461  ;;  %v1669_v57 = vmul.f32 1.442695, %v1561_v16  ;;  %v1671_v15 = vmul.f32 1.442695, %v1562_v3 }
 0x4ee   : > { %1788 = vadd.xlane.f32.xlu1 %v1787_v58  ;;  %v1486_v39 = vpop.xlane.xlu0 %1485  ;;  %v1790_v6 = vadd.f32 %v3515_v34, %v3511_v26 }
 0x4ef   : > { %2475 = vpow2.f32 %v1669_v57  ;;  %v1559_v10 = vsub.f32 %v3286_v55, %v1486_v39  ;;  %v1560_v5 = vsub.f32 %v3281_v63, %v1486_v39 }
 0x4f0   : > { %v3521_v0 = vpop.eup %2463  ;;  %2477 = vpow2.f32 %v1671_v15  ;;  %1791 = vadd.xlane.f32.xlu0 %v1790_v6  ;;  %v3845_v6 = vld [vmem:[#allocation22_spill] sm:$0xff] }
 0x4f1   : > { %v3523_v14 = vpop.eup %2465  ;;  %v1665_v62 = vmul.f32 1.442695, %v1559_v10  ;;  %v1667_v31 = vmul.f32 1.442695, %v1560_v5 }
 0x4f2   : > { %v1483_v52 = vpop.xlane.xlu0 %1482  ;;  %v1784_v9 = vadd.f32 %v3523_v14, %v3521_v0 }
 0x4f3   : > { %2479 = vpow2.f32 %v1665_v62  ;;  %v1557_v21 = vsub.f32 %v3296_v54, %v1483_v52  ;;  %v1558_v23 = vsub.f32 %v3291_v61, %v1483_v52 }
 0x4f4   : > { %v3529_v55 = vpop.eup %2467  ;;  %2481 = vpow2.f32 %v1667_v31  ;;  %1785 = vadd.xlane.f32.xlu0 %v1784_v9  ;;  %v3846_v9 = vld [vmem:[#allocation24_spill] sm:$0xff] }
 0x4f5   : > { %v3531_v63 = vpop.eup %2469  ;;  %v1661_v4 = vmul.f32 1.442695, %v1557_v21  ;;  %v1663_v19 = vmul.f32 1.442695, %v1558_v23  ;;  %v3847_v23 = vld [vmem:[#allocation23_spill] sm:$0xff] }
 0x4f6   : > { %v1480_v25 = vpop.xlane.xlu0 %1479  ;;  %v1781_v7 = vadd.f32 %v3531_v63, %v3529_v55 }
 0x4f7   : > { %2483 = vpow2.f32 %v1661_v4  ;;  %v1555_v18 = vsub.f32 %v3306_v47, %v1480_v25  ;;  %v1556_v16 = vsub.f32 %v3301_v1, %v1480_v25 }
 0x4f8   : > { %v3537_v54 = vpop.eup %2471  ;;  %2485 = vpow2.f32 %v1663_v19  ;;  %1782 = vadd.xlane.f32.xlu1 %v1781_v7 }
 0x4f9   : > { %v3539_v61 = vpop.eup %2473  ;;  %v1657_v3 = vmul.f32 1.442695, %v1555_v18  ;;  %v1659_v58 = vmul.f32 1.442695, %v1556_v16 }
 0x4fa   : > { %v1477_v57 = vpop.xlane.xlu0 %1476  ;;  %v1778_v15 = vadd.f32 %v3539_v61, %v3537_v54 }
 0x4fb   : > { %2487 = vpow2.f32 %v1657_v3  ;;  %v1553_v39 = vsub.f32 %v3315_v27, %v1477_v57  ;;  %v1554_v10 = vsub.f32 %v3845_v6, %v1477_v57 }
 0x4fc   : > { %v3545_v47 = vpop.eup %2475  ;;  %2489 = vpow2.f32 %v1659_v58  ;;  %1779 = vadd.xlane.f32.xlu0 %v1778_v15  ;;  %v3848_v58 = vld [vmem:[#allocation25_spill] sm:$0xff] }
 0x4fd   : > { %v3547_v1 = vpop.eup %2477  ;;  %v1653_v5 = vmul.f32 1.442695, %v1553_v39  ;;  %v1655_v62 = vmul.f32 1.442695, %v1554_v10 }
 0x4fe   : > { %v1474_v31 = vpop.xlane.xlu0 %1473  ;;  %v1775_v52 = vadd.f32 %v3547_v1, %v3545_v47 }
 0x4ff   : > { %2491 = vpow2.f32 %v1653_v5  ;;  %v1551_v21 = vsub.f32 %v3846_v9, %v1474_v31  ;;  %v1552_v4 = vsub.f32 %v3847_v23, %v1474_v31 }
 0x500   : > { %v3553_v27 = vpop.eup %2479  ;;  %2493 = vpow2.f32 %v1655_v62  ;;  %1776 = vadd.xlane.f32.xlu1 %v1775_v52 }
 0x501   : > { %v3555_v19 = vpop.eup %2481  ;;  %v1649_v25 = vmul.f32 1.442695, %v1551_v21  ;;  %v1651_v7 = vmul.f32 1.442695, %v1552_v4 }
 0x502   : > { %v1471_v18 = vpop.xlane.xlu0 %1470  ;;  %v1772_v16 = vadd.f32 %v3555_v19, %v3553_v27 }
 0x503   : > { %2495 = vpow2.f32 %v1649_v25  ;;  %v1549_v3 = vsub.f32 %v3331_v51, %v1471_v18  ;;  %v1550_v57 = vsub.f32 %v3848_v58, %v1471_v18  ;;  %v815_v58 = vld [vmem:[%s3765_s7] sm:$0xff] }
 0x504   : > { %v3561_v15 = vpop.eup %2483  ;;  %2497 = vpow2.f32 %v1651_v7  ;;  %1773 = vadd.xlane.f32.xlu0 %v1772_v16 }
 0x505   : > { %v3563_v39 = vpop.eup %2485  ;;  %v1645_v6 = vmul.f32 1.442695, %v1549_v3  ;;  %v1647_v10 = vmul.f32 1.442695, %v1550_v57  ;;  %v816_v3 = vld [vmem:[%s3765_s7 + $0x8] sm:$0xff]  ;;  %v817_v57 = vld [vmem:[%s3765_s7 + $0x10] sm:$0xff] }
 0x506   : > { %v1769_v5 = vadd.f32 %v3563_v39, %v3561_v15 }
 0x507   : > { %2499 = vpow2.f32 %v1645_v6  ;;  %v818_v6 = vld [vmem:[%s3765_s7 + $0x18] sm:$0xff] }
 0x508   : > { %v3567_v62 = vpop.eup %2487  ;;  %2501 = vpow2.f32 %v1647_v10  ;;  %1770 = vadd.xlane.f32.xlu1 %v1769_v5  ;;  %v1994_v10 = vld [vmem:[%s3767_s9] sm:$0xff]  ;;  %v1995_v5 = vld [vmem:[%s3767_s9 + $0x8] sm:$0xff] }
 0x509   : > { %v3569_v31 = vpop.eup %2489 }
 0x50a   : > { %v1766_v51 = vadd.f32 %v3569_v31, %v3567_v62 }
 0x50c   : > { %v3573_v52 = vpop.eup %2491  ;;  %1767 = vadd.xlane.f32.xlu0 %v1766_v51 }
 0x50d   : > { %v3575_v9 = vpop.eup %2493 }
 0x50e   : > { %v1763_v21 = vadd.f32 %v3575_v9, %v3573_v52 }
 0x510   : > { %v3579_v23 = vpop.eup %2495  ;;  %1764 = vadd.xlane.f32.xlu1 %v1763_v21  ;;  %v1996_v21 = vld [vmem:[%s3767_s9 + $0x10] sm:$0xff] }
 0x511   : > { %v3581_v4 = vpop.eup %2497 }
 0x512   : > { %v1760_v25 = vadd.f32 %v3581_v4, %v3579_v23 }
 0x514   : > { %v3585_v7 = vpop.eup %2499  ;;  %1761 = vadd.xlane.f32.xlu0 %v1760_v25  ;;  %v1997_v25 = vld [vmem:[%s3767_s9 + $0x18] sm:$0xff] }
 0x515   : > { %3849 = vst [vmem:[#allocation21_spill] sm:$0xff] %v3585_v7  ;;  %v3587_v18 = vpop.eup %2501 }
 0x516   : > { %v1757_v16 = vadd.f32 %v3587_v18, %v3585_v7 }
 0x518   : > { %1758 = vadd.xlane.f32.xlu1 %v1757_v16 }
 0x529   : > { %826 = vperm.xlu1 %2366, %v816_v3  }
 0x52a   : > { %821 = vperm.xlu0 %2365, %v815_v58  }
 0x52d   : > { %831 = vperm.xlu1 %2366, %v817_v57  }
 0x52e   : > { %836 = vperm.xlu0 %2365, %v818_v6  }
 0x531   : > { %2000 = vperm.xlu1 %2366, %v1994_v10   ;;  %v1756_v51 = vpop.xlane.xlu1 %1755 }
 0x532   : > { %2503 = vrcp.f32 %v1756_v51  ;;  %2005 = vperm.xlu0 %2365, %v1995_v5  }
 0x535   : > { %2010 = vperm.xlu1 %2366, %v1996_v21   ;;  %v1753_v16 = vpop.xlane.xlu1 %1752 }
 0x536   : > { %2505 = vrcp.f32 %v1753_v16  ;;  %2015 = vperm.xlu0 %2365, %v1997_v25  }
 0x539   : > { %v1750_v3 = vpop.xlane.xlu1 %1749 }
 0x53a   : > { %2507 = vrcp.f32 %v1750_v3 }
 0x53d   : > { %v1747_v58 = vpop.xlane.xlu1 %1746 }
 0x53e   : > { %2509 = vrcp.f32 %v1747_v58 }
 0x53f   : > { %v2504_v57 = vpop.eup %2503 }
 0x540   : > { %v1852_v6 = vmul.f32 %v2504_v57, %v3349_v12  ;;  %v1851_v10 = vmul.f32 %v2504_v57, %v3347_v40 }
 0x541   : > { %v1744_v5 = vpop.xlane.xlu1 %1743 }
 0x542   : > { %2511 = vrcp.f32 %v1744_v5  ;;  %1901 = vmatprep.subr.mxu0 %v1852_v6 }
 0x543   : > { %v2506_v51 = vpop.eup %2505  ;;  %1902 = vmatpush1.xpose.msra.mxu0 %v1851_v10 }
 0x544   : > { %v1849_v7 = vmul.f32 %v2506_v51, %v3357_v30  ;;  %v1848_v21 = vmul.f32 %v2506_v51, %v3352_v45 }
 0x545   : > { %v1741_v16 = vpop.xlane.xlu1 %1740  ;;  %v1726_v5 = vpop.xlane.xlu0 %1725 }
 0x546   : > { %1903 = vmatprep.subr.mxu0 %v1849_v7  ;;  %2513 = vrcp.f32 %v1741_v16 }
 0x547   : > { %v2508_v25 = vpop.eup %2507  ;;  %1904 = vmatpush1.xpose.msra.mxu0 %v1848_v21 }
 0x548   : > { %v1846_v3 = vmul.f32 %v2508_v25, %v3367_v37  ;;  %v1845_v12 = vmul.f32 %v2508_v25, %v3362_v43 }
 0x549   : > { %v1738_v58 = vpop.xlane.xlu1 %1737 }
 0x54a   : > { %1905 = vmatprep.subr.mxu0 %v1846_v3  ;;  %2515 = vrcp.f32 %v1738_v58  ;;  %v1720_v3 = vpop.xlane.xlu0 %1719 }
 0x54b   : > { %v2510_v40 = vpop.eup %2509  ;;  %1906 = vmatpush1.xpose.msra.mxu0 %v1845_v12 }
 0x54c   : > { %v1843_v57 = vmul.f32 %v2510_v40, %v3377_v17  ;;  %v1842_v30 = vmul.f32 %v2510_v40, %v3372_v32 }
 0x54d   : > { %v1735_v6 = vpop.xlane.xlu1 %1734 }
 0x54e   : > { %1907 = vmatprep.subr.mxu0 %v1843_v57  ;;  %2517 = vrcp.f32 %v1735_v6 }
 0x54f   : > { %v2512_v45 = vpop.eup %2511  ;;  %1908 = vmatpush1.xpose.msra.mxu0 %v1842_v30  ;;  %v1714_v30 = vpop.xlane.xlu0 %1713 }
 0x550   : > { %v1840_v7 = vmul.f32 %v2512_v45, %v3387_v60  ;;  %v1839_v37 = vmul.f32 %v2512_v45, %v3382_v56 }
 0x551   : > { %v1732_v10 = vpop.xlane.xlu1 %1731 }
 0x552   : > { %2519 = vrcp.f32 %v1732_v10  ;;  %1909 = vmatprep.subr.mxu0 %v1840_v7 }
 0x553   : > { %1910 = vmatpush1.xpose.msra.mxu0 %v1839_v37  ;;  %v2514_v43 = vpop.eup %2513 }
 0x554   : > { %v1837_v17 = vmul.f32 %v2514_v43, %v3395_v44  ;;  %v1836_v32 = vmul.f32 %v2514_v43, %v3391_v28  ;;  %v3853_v43 = vld [vmem:[#allocation18_spill] sm:$0xff] }
 0x555   : > { %v1729_v51 = vpop.xlane.xlu1 %1728 }
 0x556   : > { %2521 = vrcp.f32 %v1729_v51  ;;  %1911 = vmatprep.subr.mxu0 %v1837_v17  ;;  %v3854_v17 = vld [vmem:[#allocation19_spill] sm:$0xff] }
 0x557   : > { %2523 = vrcp.f32 %v1726_v5  ;;  %v2516_v21 = vpop.eup %2515  ;;  %1912 = vmatpush1.xpose.msra.mxu0 %v1836_v32  ;;  %v3855_v32 = vld [vmem:[#allocation15_spill] sm:$0xff] }
 0x558   : > { %v1834_v60 = vmul.f32 %v2516_v21, %v3409_v13  ;;  %v1833_v56 = vmul.f32 %v2516_v21, %v3402_v35 }
 0x559   : > { %v1723_v16 = vpop.xlane.xlu1 %1722 }
 0x55a   : > { %2525 = vrcp.f32 %v1723_v16  ;;  %1913 = vmatprep.subr.mxu0 %v1834_v60 }
 0x55b   : > { %v2518_v25 = vpop.eup %2517  ;;  %1914 = vmatpush1.xpose.msra.mxu0 %v1833_v56  ;;  %2527 = vrcp.f32 %v1720_v3 }
 0x55c   : > { %v1831_v12 = vmul.f32 %v2518_v25, %v3423_v46  ;;  %v1830_v44 = vmul.f32 %v2518_v25, %v3416_v42  ;;  %v3850_v46 = vld [vmem:[#allocation16_spill] sm:$0xff]  ;;  %v3851_v42 = vld [vmem:[#allocation13_spill] sm:$0xff] }
 0x55d   : > { %v1717_v58 = vpop.xlane.xlu1 %1716  ;;  %v3856_v25 = vld [vmem:[#allocation12_spill] sm:$0xff] }
 0x55e   : > { %1915 = vmatprep.subr.mxu0 %v1831_v12  ;;  %2529 = vrcp.f32 %v1717_v58  ;;  %v3857_v58 = vld [vmem:[#allocation26_spill] sm:$0xff] }
 0x55f   : > { %v2520_v28 = vpop.eup %2519  ;;  %1916 = vmatpush1.xpose.msra.mxu0 %v1830_v44  ;;  %2531 = vrcp.f32 %v1714_v30 }
 0x560   : > { %v1828_v40 = vmul.f32 %v2520_v28, %v3435_v33  ;;  %v1827_v13 = vmul.f32 %v2520_v28, %v3429_v48  ;;  %v3852_v33 = vld [vmem:[#allocation20_spill] sm:$0xff] }
 0x561   : > { %v1711_v10 = vpop.xlane.xlu1 %1710 }
 0x562   : > { %1917 = vmatprep.subr.mxu0 %v1828_v40  ;;  %2533 = vrcp.f32 %v1711_v10 }
 0x563   : > { %v2522_v35 = vpop.eup %2521  ;;  %1918 = vmatpush1.xpose.msra.mxu0 %v1827_v13  ;;  %v3858_v13 = vld [vmem:[#allocation17_spill] sm:$0xff] }
 0x564   : > { %v2524_v57 = vpop.eup %2523  ;;  %v1825_v6 = vmul.f32 %v2522_v35, %v3441_v53  ;;  %v1824_v45 = vmul.f32 %v2522_v35, %v3850_v46 }
 0x565   : > { %v1822_v7 = vmul.f32 %v2524_v57, %v3851_v42  ;;  %v1821_v48 = vmul.f32 %v2524_v57, %v3852_v33 }
 0x566   : > { %1919 = vmatprep.subr.mxu0 %v1825_v6  ;;  %v3859_v6 = vld [vmem:[#allocation14_spill] sm:$0xff] }
 0x567   : > { %v2526_v37 = vpop.eup %2525  ;;  %1920 = vmatpush1.xpose.msra.mxu0 %v1824_v45 }
 0x568   : > { %1921 = vmatprep.subr.mxu0 %v1822_v7  ;;  %v1819_v5 = vmul.f32 %v2526_v37, %v3853_v43  ;;  %v2528_v51 = vpop.eup %2527  ;;  %v1818_v53 = vmul.f32 %v2526_v37, %v3854_v17 }
 0x569   : > { %v1816_v21 = vmul.f32 %v2528_v51, %v3855_v32  ;;  %v1815_v3 = vmul.f32 %v2528_v51, %v3856_v25 }
 0x56b   : > { %1922 = vmatpush1.xpose.msra.mxu0 %v1821_v48  ;;  %v2530_v16 = vpop.eup %2529 }
 0x56c   : > { %1923 = vmatprep.subr.mxu0 %v1819_v5  ;;  %v1813_v12 = vmul.f32 %v2530_v16, %v3453_v41  ;;  %v2532_v44 = vpop.eup %2531  ;;  %v1812_v40 = vmul.f32 %v2530_v16, %v3857_v58 }
 0x56d   : > { %v1801_v60 = vpop.xlane.xlu1 %1800  ;;  %v1810_v35 = vmul.f32 %v2532_v44, %v3858_v13  ;;  %v1809_v46 = vmul.f32 %v2532_v44, %v3859_v6 }
 0x56f   : > { %1924 = vmatpush1.xpose.msra.mxu0 %v1818_v53  ;;  %v2534_v57 = vpop.eup %2533 }
 0x570   : > { %1925 = vmatprep.subr.mxu0 %v1816_v21  ;;  %v1807_v45 = vmul.f32 %v2534_v57, %v3461_v22  ;;  %v1806_v41 = vmul.f32 %v2534_v57, %v3457_v29 }
 0x571   : > { %v1804_v56 = vpop.xlane.xlu0 %1803 }
 0x572   : > { %2535 = vrcp.f32 %v1804_v56 }
 0x573   : > { %2537 = vrcp.f32 %v1801_v60  ;;  %1926 = vmatpush1.xpose.msra.mxu0 %v1815_v3  ;;  %v1795_v30 = vpop.xlane.xlu1 %1794 }
 0x574   : > { %1927 = vmatprep.subr.mxu0 %v1813_v12 }
 0x575   : > { %v1798_v28 = vpop.xlane.xlu0 %1797 }
 0x576   : > { %2539 = vrcp.f32 %v1798_v28 }
 0x577   : > { %1928 = vmatpush1.xpose.msra.mxu0 %v1812_v40  ;;  %2541 = vrcp.f32 %v1795_v30  ;;  %v1789_v10 = vpop.xlane.xlu1 %1788  ;;  %v917_v40 = vpop.f32.mrf.mxu0 }
 0x578   : > { %1929 = vmatprep.subr.mxu0 %v1810_v35 }
 0x579   : > { %v1792_v42 = vpop.xlane.xlu0 %1791  ;;  %v919_v57 = vpop.f32.mrf.mxu0 }
 0x57a   : > { %2543 = vrcp.f32 %v1792_v42 }
 0x57b   : > { %1930 = vmatpush1.xpose.msra.mxu0 %v1809_v46  ;;  %2545 = vrcp.f32 %v1789_v10 }
 0x57c   : > { %1931 = vmatprep.subr.mxu0 %v1807_v45 }
 0x57d   : > { %v1786_v22 = vpop.xlane.xlu0 %1785 }
 0x57e   : > { %2547 = vrcp.f32 %v1786_v22 }
 0x57f   : > { %v2536_v7 = vpop.eup %2535  ;;  %1932 = vmatpush1.xpose.msra.mxu0 %v1806_v41 }
 0x580   : > { %v2538_v37 = vpop.eup %2537  ;;  %v1900_v33 = vmul.f32 %v2536_v7, %v3487_v24  ;;  %v1899_v48 = vmul.f32 %v2536_v7, %v3485_v36 }
 0x581   : > { %v1897_v43 = vmul.f32 %v2538_v37, %v3479_v49  ;;  %v1896_v51 = vmul.f32 %v2538_v37, %v3477_v11  ;;  %v1783_v53 = vpop.xlane.xlu1 %1782  ;;  %v923_v37 = vpop.f32.mrf.mxu0 }
 0x582   : > { %1933 = vmatprep.subr.mxu0 %v1900_v33  ;;  %2549 = vrcp.f32 %v1783_v53 }
 0x583   : > { %v2540_v5 = vpop.eup %2539  ;;  %1934 = vmatpush2.xpose.msra.mxu0 %v1899_v48 }
 0x584   : > { %1935 = vmatprep.subr.mxu0 %v1897_v43  ;;  %v1894_v29 = vmul.f32 %v2540_v5, %v3501_v50  ;;  %v2542_v17 = vpop.eup %2541  ;;  %v1893_v24 = vmul.f32 %v2540_v5, %v3497_v59 }
 0x585   : > { %v1891_v36 = vmul.f32 %v2542_v17, %v3493_v38  ;;  %v1780_v49 = vpop.xlane.xlu0 %1779  ;;  %v1890_v21 = vmul.f32 %v2542_v17, %v3489_v8 }
 0x586   : > { %2551 = vrcp.f32 %v1780_v49 }
 0x587   : > { %1936 = vmatpush2.xpose.msra.mxu0 %v1896_v51  ;;  %v2544_v32 = vpop.eup %2543 }
 0x588   : > { %1937 = vmatprep.subr.mxu0 %v1894_v29  ;;  %v1888_v11 = vmul.f32 %v2544_v32, %v3515_v34  ;;  %v2546_v16 = vpop.eup %2545  ;;  %v1887_v60 = vmul.f32 %v2544_v32, %v3511_v26 }
 0x589   : > { %v1777_v50 = vpop.xlane.xlu1 %1776  ;;  %v1885_v59 = vmul.f32 %v2546_v16, %v3507_v20  ;;  %v1884_v25 = vmul.f32 %v2546_v16, %v3503_v2 }
 0x58a   : > { %2553 = vrcp.f32 %v1777_v50 }
 0x58b   : > { %1938 = vmatpush2.xpose.msra.mxu0 %v1893_v24  ;;  %v2548_v56 = vpop.eup %2547 }
 0x58c   : > { %1939 = vmatprep.subr.mxu0 %v1891_v36  ;;  %v1882_v8 = vmul.f32 %v2548_v56, %v3523_v14  ;;  %v1881_v12 = vmul.f32 %v2548_v56, %v3521_v0 }
 0x58d   : > { %v1774_v38 = vpop.xlane.xlu0 %1773 }
 0x58e   : > { %2555 = vrcp.f32 %v1774_v38 }
 0x58f   : > { %1940 = vmatpush2.xpose.msra.mxu0 %v1890_v21  ;;  %v2550_v3 = vpop.eup %2549 }
 0x590   : > { %1941 = vmatprep.subr.mxu0 %v1888_v11  ;;  %v1879_v26 = vmul.f32 %v2550_v3, %v3531_v63  ;;  %v1878_v28 = vmul.f32 %v2550_v3, %v3529_v55  ;;  %v1991_v3 = vld [vmem:[#allocation5 + $0x8] sm:$0xff] }
 0x591   : > { %v1771_v34 = vpop.xlane.xlu1 %1770 }
 0x592   : > { %2557 = vrcp.f32 %v1771_v34  ;;  %v1992_v34 = vld [vmem:[#allocation5 + $0x10] sm:$0xff] }
 0x593   : > { %1942 = vmatpush2.xpose.msra.mxu0 %v1887_v60  ;;  %v2552_v44 = vpop.eup %2551 }
 0x594   : > { %1943 = vmatprep.subr.mxu0 %v1885_v59  ;;  %v1876_v2 = vmul.f32 %v2552_v44, %v3539_v61  ;;  %v1875_v0 = vmul.f32 %v2552_v44, %v3537_v54 }
 0x595   : > { %v1768_v20 = vpop.xlane.xlu0 %1767 }
 0x596   : > { %2559 = vrcp.f32 %v1768_v20 }
 0x597   : > { %1944 = vmatpush2.xpose.msra.mxu0 %v1884_v25  ;;  %v2554_v58 = vpop.eup %2553  ;;  %v1990_v25 = vld [vmem:[#allocation5] sm:$0xff] }
 0x598   : > { %1945 = vmatprep.subr.mxu0 %v1882_v8  ;;  %v1873_v63 = vmul.f32 %v2554_v58, %v3547_v1  ;;  %v1872_v6 = vmul.f32 %v2554_v58, %v3545_v47  ;;  %v3861_v8 = vmov 0.0  }
 0x599   : > { %v1765_v14 = vpop.xlane.xlu1 %1764 }
 0x59a   : > { %2561 = vrcp.f32 %v1765_v14 }
 0x59b   : > { %1946 = vmatpush2.xpose.msra.mxu0 %v1881_v12  ;;  %v2556_v35 = vpop.eup %2555  ;;  %v1993_v12 = vld [vmem:[#allocation5 + $0x18] sm:$0xff] }
 0x59c   : > { %1947 = vmatprep.subr.mxu0 %v1879_v26  ;;  %v1870_v61 = vmul.f32 %v2556_v35, %v3555_v19  ;;  %v1869_v54 = vmul.f32 %v2556_v35, %v3553_v27 }
 0x59d   : > { %v1762_v13 = vpop.xlane.xlu0 %1761 }
 0x59e   : > { %2563 = vrcp.f32 %v1762_v13 }
 0x59f   : > { %1948 = vmatpush2.xpose.msra.mxu0 %v1878_v28  ;;  %v2558_v46 = vpop.eup %2557 }
 0x5a0   : > { %1949 = vmatprep.subr.mxu0 %v1876_v2  ;;  %v1867_v1 = vmul.f32 %v2558_v46, %v3563_v39  ;;  %v1866_v41 = vmul.f32 %v2558_v46, %v3561_v15  ;;  %v925_v39 = vpop.f32.mrf.mxu0  ;;  %v2567_v2 = vld [vmem:[%s2860_s15] sm:$0xff] }
 0x5a1   : > { %v1759_v45 = vpop.xlane.xlu1 %1758 }
 0x5a2   : > { %2565 = vrcp.f32 %v1759_v45  ;;  %v2570_v45 = vld [vmem:[%s2860_s15 + $0x18] sm:$0xff] }
 0x5a3   : > { %1950 = vmatpush2.xpose.msra.mxu0 %v1875_v0  ;;  %v2560_v42 = vpop.eup %2559  ;;  %v2568_v0 = vld [vmem:[%s2860_s15 + $0x8] sm:$0xff] }
 0x5a4   : > { %1951 = vmatprep.subr.mxu0 %v1873_v63  ;;  %v1864_v47 = vmul.f32 %v2560_v42, %v3569_v31  ;;  %v1863_v19 = vmul.f32 %v2560_v42, %v3567_v62  ;;  %v929_v31 = vpop.f32.mrf.mxu0 }
 0x5a5   : > { %v822_v30 = vpop.permute.xlu0 %821  ;;  %v827_v62 = vpop.permute.xlu1 %826 }
 0x5a6   : > { %v920_v55 = vadd.f32 %v919_v57, %v822_v30  ;;  %v931_v51 = vpop.f32.mrf.mxu0  ;;  %v918_v29 = vadd.f32 %v917_v40, %v822_v30  ;;  %v2569_v30 = vld [vmem:[%s2860_s15 + $0x10] sm:$0xff] }
 0x5a7   : > { %1952 = vmatpush2.xpose.msra.mxu0 %v1872_v6  ;;  %v2562_v7 = vpop.eup %2561 }
 0x5a8   : > { %1965 = vmatprep.mubr.f32.mxu0 %v920_v55  ;;  %1953 = vmatprep.subr.mxu0 %v1870_v61  ;;  %v1861_v10 = vmul.f32 %v2562_v7, %v3575_v9  ;;  %v1860_v27 = vmul.f32 %v2562_v7, %v3573_v52  ;;  %v3860_v9 = vld [vmem:[#allocation21_spill] sm:$0xff]  ;;  %v926_v52 = vadd.f32 %v925_v39, %v827_v62  ;;  %v935_v17 = vpop.f32.mrf.mxu0 }
 0x5a9   : > { %v832_v53 = vpop.permute.xlu1 %831 }
 0x5aa   : > { %v932_v24 = vadd.f32 %v931_v51, %v832_v53  ;;  %v937_v36 = vpop.f32.mrf.mxu0 }
 0x5ab   : > { %1954 = vmatpush2.xpose.msra.mxu0 %v1869_v54  ;;  %v2564_v33 = vpop.eup %2563 }
 0x5ac   : > { %1955 = vmatprep.subr.mxu0 %v1867_v1  ;;  %v1858_v48 = vmul.f32 %v2564_v33, %v3581_v4  ;;  %v1857_v15 = vmul.f32 %v2564_v33, %v3579_v23  ;;  %v924_v4 = vadd.f32 %v923_v37, %v827_v62  ;;  %v837_v23 = vpop.permute.xlu0 %836 }
 0x5ad   : > { %v938_v32 = vadd.f32 %v937_v36, %v837_v23  ;;  %v936_v49 = vadd.f32 %v935_v17, %v837_v23  ;;  %v2001_v26 = vpop.permute.xlu1 %2000 }
 0x5af   : > { %1956 = vmatpush2.xpose.msra.mxu0 %v1866_v41  ;;  %v2566_v43 = vpop.eup %2565  ;;  %v2571_v41 = vld [vmem:[%s2860_s15 + $0x20] sm:$0xff] }
 0x5b0   : > { %1957 = vmatprep.subr.mxu0 %v1864_v47  ;;  %v1855_v5 = vmul.f32 %v2566_v43, %v3587_v18  ;;  %v1854_v22 = vmul.f32 %v2566_v43, %v3860_v9  ;;  %v930_v18 = vadd.f32 %v929_v31, %v832_v53  ;;  %v2006_v40 = vpop.permute.xlu0 %2005  ;;  %v2574_v31 = vld [vmem:[%s2860_s15 + $0x38] sm:$0xff] }
 0x5b1   : > { %v2011_v61 = vpop.permute.xlu1 %2010 }
 0x5b3   : > { %1958 = vmatpush2.xpose.msra.mxu0 %v1863_v19 }
 0x5b4   : > { %1959 = vmatprep.subr.mxu0 %v1861_v10  ;;  %v2016_v19 = vpop.permute.xlu0 %2015  ;;  %v2572_v10 = vld [vmem:[%s2860_s15 + $0x28] sm:$0xff] }
 0x5b7   : > { %1960 = vmatpush2.xpose.msra.mxu0 %v1860_v27 }
 0x5b8   : > { %1961 = vmatprep.subr.mxu0 %v1858_v48  ;;  %v2573_v48 = vld [vmem:[%s2860_s15 + $0x30] sm:$0xff] }
 0x5bb   : > { %1962 = vmatpush2.xpose.msra.mxu0 %v1857_v15 }
 0x5bc   : > { %1963 = vmatprep.subr.mxu0 %v1855_v5 }
 0x5bf   : > { %1964 = vmatpush2.xpose.msra.mxu0 %v1854_v22 }
 0x5c2   : > { %1966 = vmatmul.mubr.f32.vlgmr.msra.gmra.mxu0 %v918_v29 }
 0x5c3   : > { %1971 = vmatprep.mubr.f32.mxu0 %v926_v52 }
 0x5c6   : > { %1972 = vmatmul.mubr.f32.gmra.mxu0 %v924_v4 }
 0x5c7   : > { %1977 = vmatprep.mubr.f32.mxu0 %v932_v24 }
 0x5ca   : > { %1978 = vmatmul.mubr.f32.gmra.mxu0 %v930_v18 }
 0x5cb   : > { %1983 = vmatprep.mubr.f32.mxu0 %v938_v32 }
 0x5ce   : > { %1984 = vmatmul.mubr.f32.gmra.mxu0 %v936_v49 }
 0x682   : > { %v1967_v21 = vpop.f32.mrf.mxu0 }
 0x684   : > { %v1969_v11 = vpop.f32.mrf.mxu0 }
 0x686   : > { %v1973_v16 = vpop.f32.mrf.mxu0 }
 0x688   : > { %v1975_v50 = vpop.f32.mrf.mxu0 }
 0x68a   : > { %v1979_v60 = vpop.f32.mrf.mxu0 }
 0x68c   : > { %v1981_v59 = vpop.f32.mrf.mxu0 }
 0x68e   : > { %v1985_v56 = vpop.f32.mrf.mxu0 }
 0x690   : > { %v1987_v38 = vpop.f32.mrf.mxu0 }
 0x691   : > { %2054 = vmatprep.subr.mxu1 %v1987_v38 }
 0x692   : > { %2055 = vmatpush1.msra.mxu1 %v1985_v56 }
 0x693   : > { %2056 = vmatprep.subr.mxu1 %v1981_v59 }
 0x694   : > { %2057 = vmatpush1.msra.mxu1 %v1979_v60 }
 0x695   : > { %2058 = vmatprep.subr.mxu1 %v1975_v50 }
 0x696   : > { %2059 = vmatpush1.msra.mxu1 %v1973_v16 }
 0x697   : > { %2060 = vmatprep.subr.mxu1 %v1969_v11 }
 0x698   : > { %2061 = vmatpush1.msra.mxu1 %v1967_v21 }
 0x699   : > { %2288 = vmatmul.mubr.msk.f32.vlgmr.msra.gmra.mxu1 %vm580_vm0, %v1990_v25 }
 0x69a   : > { %2100 = vmatprep.mubr.f32.mxu1 %v3861_v8 }
 0x69d   : > { %2289 = vmatmul.mubr.msk.f32.gmra.mxu1 %vm580_vm0, %v1991_v3 }
 0x69e   : > { %2106 = vmatprep.mubr.f32.mxu1 %v3861_v8 }
 0x6a1   : > { %2290 = vmatmul.mubr.msk.f32.gmra.mxu1 %vm580_vm0, %v1992_v34 }
 0x6a2   : > { %2112 = vmatprep.mubr.f32.mxu1 %v3861_v8 }
 0x6a5   : > { %2291 = vmatmul.mubr.msk.f32.gmra.mxu1 %vm580_vm0, %v1993_v12 }
 0x759   : > { %v2096_v44 = vpop.f32.mrf.mxu1 }
 0x75a   : > { %v2097_v20 = vadd.f32 %v2096_v44, %v2001_v26 }
 0x75b   : > { %v2098_v28 = vpop.f32.mrf.mxu1 }
 0x75c   : > { %v2119_v58 = vadd.f32 %v2567_v2, %v2097_v20  ;;  %v2099_v14 = vadd.f32 %v2098_v28, %v2001_v26 }
 0x75d   : > { %v2102_v13 = vpop.f32.mrf.mxu1 }
 0x75e   : > { %2127 = vst [vmem:[%s3690_s26] sm:$0xff] %v2119_v58  ;;  %v2120_v63 = vadd.f32 %v2568_v0, %v2099_v14  ;;  %v2103_v35 = vadd.f32 %v2102_v13, %v2006_v40 }
 0x75f   : > { %v2104_v57 = vpop.f32.mrf.mxu1 }
 0x760   : > { %2128 = vst [vmem:[%s3690_s26 + $0x8] sm:$0xff] %v2120_v63  ;;  %v2121_v55 = vadd.f32 %v2569_v30, %v2103_v35  ;;  %v2105_v6 = vadd.f32 %v2104_v57, %v2006_v40 }
 0x761   : > { %v2108_v46 = vpop.f32.mrf.mxu1 }
 0x762   : > { %2129 = vst [vmem:[%s3690_s26 + $0x10] sm:$0xff] %v2121_v55  ;;  %v2122_v54 = vadd.f32 %v2570_v45, %v2105_v6  ;;  %v2109_v1 = vadd.f32 %v2108_v46, %v2011_v61 }
 0x763   : > { %v2110_v42 = vpop.f32.mrf.mxu1 }
 0x764   : > { %2130 = vst [vmem:[%s3690_s26 + $0x18] sm:$0xff] %v2122_v54  ;;  %v2123_v47 = vadd.f32 %v2571_v41, %v2109_v1  ;;  %v2111_v7 = vadd.f32 %v2110_v42, %v2011_v61 }
 0x765   : > { %v2114_v37 = vpop.f32.mrf.mxu1 }
 0x766   : > { %2131 = vst [vmem:[%s3690_s26 + $0x20] sm:$0xff] %v2123_v47  ;;  %v2124_v33 = vadd.f32 %v2572_v10, %v2111_v7  ;;  %v2115_v27 = vadd.f32 %v2114_v37, %v2016_v19 }
 0x767   : > { %v2116_v39 = vpop.f32.mrf.mxu1 }
 0x768   : > { %2132 = vst [vmem:[%s3690_s26 + $0x28] sm:$0xff] %v2124_v33  ;;  %v2125_v43 = vadd.f32 %v2573_v48, %v2115_v27  ;;  %v2117_v15 = vadd.f32 %v2116_v39, %v2016_v19 }
 0x76a   : > { %2133 = vst [vmem:[%s3690_s26 + $0x30] sm:$0xff] %v2125_v43  ;;  %v2126_v5 = vadd.f32 %v2574_v31, %v2117_v15 }
 0x76c   : > { %2134 = vst [vmem:[%s3690_s26 + $0x38] sm:$0xff] %v2126_v5 }
 0x76d   : > { %2640 = shalt.err (!%p2637_p3)
}
 0x76e   : > { %s2641_s15 = scalar_lea.hbm %s3713_s24, 1024  ;;  %s2645_s13 = scalar_lea.hbm %s3769_s11, 2048 }
 0x76f   : > { %p2642_p2 = scmp.ne.s32.totalorder %s3713_s24, %s2641_s15  ;;  %p2646_p7 = scmp.lt.s32.totalorder %s3713_s24, %s3769_s11 }
 0x770   : > { %p2647_p6 = scmp.lt.s32.totalorder %s2645_s13, %s2641_s15 }
 0x771   : > { %p2643_p4 = pnand %p2642_p2, %p2804_p5 }
 0x772   : > { %p2648_p9 = por %p2647_p6, %p2646_p7 }
 0x773   : > { %p2644_p13 = pneg %p2643_p4 }
 0x775   : > { %p2649_p10 = pnand %p2648_p9, %p2644_p13 }
 0x777   : > { %2652 = shalt.err (!%p2649_p10)
}
 0x778   : > { %s2704_s0 = smov 256   ;;  %s2705_s25 = smov 16  }
 0x779   : > { %2307 = dma.vmem_to_hbm [thread:$0]  (%p2804_p5), %s3706_s12, 1024, %s3713_s24, %s3718_s21, %s2704_s0, %s2704_s0, %s2705_s25  }
 0x77a PF: > { %p2324_p12 = scmp.ge.s32.totalorder %s2695_s20, 2  ;;  %s2164_s30 = sand.u32 1, %s2683_s17  }
 0x77b   : > { %p3862_p8 = scmp.ne.s32.totalorder %s3802_s28, 0  ;;  %s2165_s16 = scalar_lea.sflag [#allocation4], %s2164_s30 }
 0x77d   : > { %p2317_p11 = pnand %p2324_p12, %p3862_p8 }
 0x77f   : > { %p2318_p0 = pneg %p2317_p11 }
 0x781   : > { %2678 = dma.done.wait (%p2318_p0), %s2165_s16, 1024  }
 0x782   : > { %2680 = vsyncadd (%p2318_p0), %s2165_s16, 4294966272  ;;  %s3863_s15 = sld [smem:[#allocation11_spill]]  ;;  %p23_p1 = scmp.ge.s32.totalorder %s2791_s23, 4  }
 0x783   : > { %s3864_s17 = smov %s2687_s18  ;;  %s3865_s18 = smov %s2691_s19 }
 0x784   : > { %s3867_s20 = smov %s2791_s23  ;;  %25 = sbr.rel (!%p23_p1) target bundleno = 7 (0x7), region = 108 }
 0x788   : > { %s3866_s19 = smov %s3863_s15 }
 0x789   :  { %2170 = vsyncpa [#allocation3], 1 }
 0x78a   :  { %2172 = vsyncpa [#allocation3 + $0x1], 1 }
 0x78b   :  { %2173 = vsyncpa [#allocation6], 1 }
 0x78c   :  { %2174 = vsyncpa [#allocation4], 1 }
 0x78d   :  { %2176 = vsyncpa [#allocation4 + $0x1], 1 }

</bundles_post_ra>
